<compile_context>
chip_gen: v6e
topology: v6e:2x2x1
jax: 0.10.0
libtpu: 0.0.40
codegen_flags: <defaults>
</compile_context>

<pallas_src>
import math
import functools

import jax
import jax.numpy as jnp
from jax import lax
from jax.experimental import pallas as pl
from jax.experimental.pallas import tpu as pltpu


def _qkv_attn_kernel(q_ref, k_ref, v_ref, o_ref, *, scale_sq):
    # q_ref/o_ref: (NB, G, C, TQ);  k_ref/v_ref: (NB, G, C, T)
    nb, g, c, tq = q_ref.shape
    t = k_ref.shape[-1]
    b = nb * g

    # Fold both 1/ch**0.25 scales into a single multiply on the small q tile.
    q = (q_ref[...] * scale_sq).reshape(b, c, tq)
    k = k_ref[...].reshape(b, c, t)
    v = v_ref[...].reshape(b, c, t)

    # w[b, t, s] = sum_c q[b, c, t] * k[b, c, s]   (contract channel axis; no transposes)
    w = lax.dot_general(
        q, k,
        dimension_numbers=(((1,), (1,)), ((0,), (0,))),
        preferred_element_type=jnp.float32)            # (B, TQ, T) f32

    # Numerically-stable softmax numerator in f32; normalization is deferred.
    w_max = jnp.max(w, axis=-1, keepdims=True)
    p = jnp.exp(w - w_max)                             # unnormalized probs, f32
    denom = jnp.sum(p, axis=-1)                        # (B, TQ) f32

    # a[b, c, t] = sum_s v[b, c, s] * p[b, t, s]      (A.B^T form; no transposes)
    a = lax.dot_general(
        v, p.astype(v.dtype),
        dimension_numbers=(((2,), (2,)), ((0,), (0,))),
        preferred_element_type=jnp.float32)            # (B, C, TQ) f32

    # Deferred normalization on the small accumulator, exact reciprocal
    # (restores PyTorch f32-softmax numerics).
    a = a * (1.0 / denom)[:, None, :]
    o_ref[...] = a.reshape(nb, g, c, tq).astype(o_ref.dtype)


def _vmem_budget_and_limit():
    """(tile_budget_bytes, vmem_limit_bytes, single_buffer_kv_when_tiled)."""
    cap = None
    try:
        cap = getattr(pltpu.get_tpu_info(), "vmem_capacity_bytes", None)
    except Exception:
        cap = None
    if cap is None:
        cap = 64 * 1024 * 1024                   # conservative: fits every generation
    if cap >= 96 * 1024 * 1024:                  # v5e / v6e: 128 MiB physical VMEM
        return 96 * 1024 * 1024, 112 * 1024 * 1024, False
    # v7x-class (64 MiB physical): leave headroom for compiler scratch and
    # single-buffer K/V when the query axis is tiled.
    return 44 * 1024 * 1024, 56 * 1024 * 1024, True


def _choose_tiles(bs, n_heads, ch, length, itemsize, vmem_budget,
                  single_kv_when_tiled, max_tq=1024, max_nb=8):
    """Pick (batch block NB, heads-per-step G, query tile TQ) under the budget."""
    slack = 4 * 1024 * 1024                      # compiler temporaries / internal scratch

    def kv_buffers(tq):
        tiled = (length // tq) > 1
        return 1 if (tiled and single_kv_when_tiled) else 2

    def fits(nb, g, tq):
        qo = 2 * 2 * itemsize * nb * g * ch * tq                       # q + out, double-buffered
        kv = kv_buffers(tq) * 2 * itemsize * nb * g * ch * length      # k + v blocks
        interm = (4 * (2 * nb * g * tq * length                        # w, exp(w) in f32
                       + nb * g * ch * tq                              # f32 accumulator
                       + nb * g * tq)                                  # denom
                  + itemsize * nb * g * tq * length)                   # p cast for matmul
        return qo + kv + interm + slack <= vmem_budget

    if length <= max_tq:
        tq_cands = [length]
    else:
        # TQ must be a multiple of 128 that divides T (or T itself).
        tq_cands = [t for t in range(max_tq, 0, -128) if length % t == 0]
        if not tq_cands:
            tq_cands = [length]
    g_cands = [g for g in range(n_heads, 0, -1) if n_heads % g == 0]

    # Prefer the largest TQ (full-width MXU tiles); shrink G before TQ.
    for tq in tq_cands:
        for g in g_cands:
            if fits(1, g, tq):
                nb = 1
                # Small-T / large-batch: pack more batches per step so MXU work
                # amortizes the fixed per-grid-step overhead.
                if g == n_heads and tq == length:
                    for cand in range(min(bs, max_nb), 1, -1):
                        if bs % cand == 0 and fits(cand, g, tq):
                            nb = cand
                            break
                return nb, g, tq

    # Nothing satisfied the (conservative) budget estimate: degrade to the
    # smallest legal config; the vmem_limit keeps real headroom above budget.
    # TODO(synk): add key-axis tiling (online softmax) for extremely long T.
    return 1, 1, tq_cands[-1]


def _make_spec(block_shape, index_map, pipeline_mode=None):
    if pipeline_mode is not None:
        try:
            return pl.BlockSpec(block_shape, index_map, pipeline_mode=pipeline_mode)
        except TypeError:            # older jax without pipeline_mode kwarg
            pass
    return pl.BlockSpec(block_shape, index_map)


def qkv_attention(qkv, n_heads):
    """Pallas implementation of QKVAttention.forward.

    :param qkv: [N, 3*H*C, T] array of Qs, Ks and Vs.
    :return: [N, H*C, T] array after attention.
    """
    bs, width, length = qkv.shape
    assert width % (3 * n_heads) == 0
    ch = width // (3 * n_heads)
    scale_sq = 1.0 / math.sqrt(ch)               # == (ch ** -0.25) ** 2

    H, C, T = n_heads, ch, length
    itemsize = jnp.dtype(qkv.dtype).itemsize

    vmem_budget, vmem_limit, single_kv_when_tiled = _vmem_budget_and_limit()
    NB, G, TQ = _choose_tiles(bs, H, C, T, itemsize, vmem_budget,
                              single_kv_when_tiled)
    n_b = bs // NB                               # batch blocks
    n_hg = H // G                                # head groups
    n_qt = T // TQ                               # query tiles

    # Metadata-only reshape: [N, 3*H*C, T] -> [N, 3*H, C, T] (no HBM copy).
    qkv4 = qkv.reshape(bs, 3 * H, C, T)

    kernel = functools.partial(_qkv_attn_kernel, scale_sq=scale_sq)

    # K/V blocks only change once per head group: single-buffer them on
    # tight-VMEM chips when the query axis is tiled.
    kv_mode = None
    if single_kv_when_tiled and n_qt > 1 and hasattr(pl, "Buffered"):
        kv_mode = pl.Buffered(1)

    # Block index maps offset directly into the shared qkv buffer:
    #   q heads at [0, H), k at [H, 2H), v at [2H, 3H) along the head axis.
    q_spec = pl.BlockSpec((NB, G, C, TQ), lambda n, h, t: (n, h, 0, t))
    k_spec = _make_spec((NB, G, C, T), lambda n, h, t: (n, n_hg + h, 0, 0), kv_mode)
    v_spec = _make_spec((NB, G, C, T), lambda n, h, t: (n, 2 * n_hg + h, 0, 0), kv_mode)
    o_spec = pl.BlockSpec((NB, G, C, TQ), lambda n, h, t: (n, h, 0, t))

    cost = pl.CostEstimate(
        flops=4 * bs * H * T * T * C,            # two T x T x C matmuls per head
        transcendentals=bs * H * T * T,          # softmax exp
        bytes_accessed=4 * bs * H * C * T * itemsize)

    out = pl.pallas_call(
        kernel,
        out_shape=jax.ShapeDtypeStruct((bs, H, C, T), qkv.dtype),
        grid_spec=pltpu.PrefetchScalarGridSpec(
            num_scalar_prefetch=0,
            grid=(n_b, n_hg, n_qt),
            in_specs=[q_spec, k_spec, v_spec],
            out_specs=o_spec,
        ),
        compiler_params=pltpu.CompilerParams(
            # Query-tile axis "arbitrary": keeps K/V reuse on one core instead
            # of duplicating K/V DMA across the v7x megacore.
            dimension_semantics=("parallel", "parallel", "arbitrary"),
            vmem_limit_bytes=vmem_limit),
        cost_estimate=cost,
    )(qkv4, qkv4, qkv4)

    return out.reshape(bs, H * C, T)


def _reference(qkv, n_heads):
    # Pure-JAX reference mirroring the PyTorch forward exactly.
    bs, width, length = qkv.shape
    ch = width // (3 * n_heads)
    q, k, v = jnp.split(qkv, 3, axis=1)
    scale = 1.0 / math.sqrt(math.sqrt(ch))
    q = (q * scale).reshape(bs * n_heads, ch, length)
    k = (k * scale).reshape(bs * n_heads, ch, length)
    v = v.reshape(bs * n_heads, ch, length)
    w = jnp.einsum('bct,bcs->bts', q, k)
    w = jax.nn.softmax(w.astype(jnp.float32), axis=-1).astype(w.dtype)
    a = jnp.einsum('bts,bcs->bct', w, v)
    return a.reshape(bs, -1, length)


if __name__ == "__main__":
    key = jax.random.PRNGKey(0)

    # Config 1: N=2, H=2, C=64, T=128  -> qkv width = 3*H*C = 384
    N, H, C, T = 2, 2, 64, 128
    qkv1 = jax.random.normal(key, (N, 3 * H * C, T), dtype=jnp.float32)
    out1 = jax.block_until_ready(qkv_attention(qkv1, n_heads=H))
    ref1 = _reference(qkv1, n_heads=H)
    assert out1.shape == (N, H * C, T)
    assert jnp.allclose(out1, ref1, atol=1e-3, rtol=1e-3)

    # Config 2: tiny, unaligned shapes.
    N2, H2, C2, T2 = 2, 2, 8, 16
    qkv2 = jax.random.normal(jax.random.PRNGKey(1),
                             (N2, 3 * H2 * C2, T2), dtype=jnp.float32)
    out2 = jax.block_until_ready(qkv_attention(qkv2, n_heads=H2))
    ref2 = _reference(qkv2, n_heads=H2)
    assert out2.shape == (N2, H2 * C2, T2)
    assert jnp.allclose(out2, ref2, atol=1e-3, rtol=1e-3)

    print("KERNEL_OK")
</pallas_src>

<mosaic_0001>
module attributes {stable_mosaic.version = 11 : i64} {
  func.func @_qkv_attn_kernel(%arg0: i32, %arg1: i32, %arg2: i32, %arg3: memref<2x2x64x128xf32, #tpu.memory_space<vmem>>, %arg4: memref<2x2x64x128xf32, #tpu.memory_space<vmem>>, %arg5: memref<2x2x64x128xf32, #tpu.memory_space<vmem>>, %arg6: memref<2x2x64x128xf32, #tpu.memory_space<vmem>>) attributes {dimension_semantics = [#tpu.dimension_semantics<parallel>, #tpu.dimension_semantics<parallel>, #tpu.dimension_semantics<arbitrary>], iteration_bounds = array<i64: 1, 1, 1>, scalar_prefetch = 0 : i64, scratch_operands = 0 : i64, tpu.core_type = #tpu.core_type<tc>, window_params = [{transform_indices = @transform_0, window_bounds = array<i64: 2, 2, 64, 128>}, {transform_indices = @transform_1, window_bounds = array<i64: 2, 2, 64, 128>}, {transform_indices = @transform_2, window_bounds = array<i64: 2, 2, 64, 128>}, {transform_indices = @transform_3, window_bounds = array<i64: 2, 2, 64, 128>}]} {
    %c0 = arith.constant 0 : index
    %c0_0 = arith.constant 0 : index
    %c0_1 = arith.constant 0 : index
    %c0_2 = arith.constant 0 : index
    %0 = vector.load %arg3[%c0, %c0_0, %c0_1, %c0_2] : memref<2x2x64x128xf32, #tpu.memory_space<vmem>>, vector<2x2x64x128xf32>
    %cst = arith.constant 1.250000e-01 : f32
    %1 = vector.broadcast %cst : f32 to vector<2x2x64x128xf32>
    %2 = arith.mulf %0, %1 : vector<2x2x64x128xf32>
    %3 = vector.shape_cast %2 : vector<2x2x64x128xf32> to vector<4x64x128xf32>
    %c0_3 = arith.constant 0 : index
    %c0_4 = arith.constant 0 : index
    %c0_5 = arith.constant 0 : index
    %c0_6 = arith.constant 0 : index
    %4 = vector.load %arg4[%c0_3, %c0_4, %c0_5, %c0_6] : memref<2x2x64x128xf32, #tpu.memory_space<vmem>>, vector<2x2x64x128xf32>
    %5 = vector.shape_cast %4 : vector<2x2x64x128xf32> to vector<4x64x128xf32>
    %c0_7 = arith.constant 0 : index
    %c0_8 = arith.constant 0 : index
    %c0_9 = arith.constant 0 : index
    %c0_10 = arith.constant 0 : index
    %6 = vector.load %arg5[%c0_7, %c0_8, %c0_9, %c0_10] : memref<2x2x64x128xf32, #tpu.memory_space<vmem>>, vector<2x2x64x128xf32>
    %7 = vector.shape_cast %6 : vector<2x2x64x128xf32> to vector<4x64x128xf32>
    %cst_11 = arith.constant dense<0.000000e+00> : vector<4x128x128xf32>
    %8 = tpu.matmul %3, %5, %cst_11 {dimension_numbers = #tpu.dot_dimension_numbers<[1], [1], [2], [2], [0, 0, 0, 2, 1, 2], [0], [0]>} : vector<4x64x128xf32>, vector<4x64x128xf32>, vector<4x128x128xf32> -> vector<4x128x128xf32>
    %cst_12 = arith.constant dense<0xFF800000> : vector<4x128xf32>
    %9 = vector.multi_reduction <maximumf>, %8, %cst_12 [2] : vector<4x128x128xf32> to vector<4x128xf32>
    %10 = vector.shape_cast %9 : vector<4x128xf32> to vector<4x128x1xf32>
    %11 = vector.broadcast %10 : vector<4x128x1xf32> to vector<4x128x128xf32>
    %12 = arith.subf %8, %11 : vector<4x128x128xf32>
    %13 = math.exp %12 : vector<4x128x128xf32>
    %cst_13 = arith.constant dense<0.000000e+00> : vector<4x128xf32>
    %14 = vector.multi_reduction <add>, %13, %cst_13 [2] : vector<4x128x128xf32> to vector<4x128xf32>
    %cst_14 = arith.constant dense<0.000000e+00> : vector<4x64x128xf32>
    %15 = tpu.matmul %7, %13, %cst_14 {dimension_numbers = #tpu.dot_dimension_numbers<[2], [2], [1], [1], [0, 0, 0, 1, 1, 1], [0], [0]>} : vector<4x64x128xf32>, vector<4x128x128xf32>, vector<4x64x128xf32> -> vector<4x64x128xf32>
    %cst_15 = arith.constant 1.000000e+00 : f32
    %16 = vector.broadcast %cst_15 : f32 to vector<4x128xf32>
    %17 = arith.divf %16, %14 : vector<4x128xf32>
    %18 = vector.shape_cast %17 : vector<4x128xf32> to vector<4x1x128xf32>
    %19 = vector.broadcast %18 : vector<4x1x128xf32> to vector<4x64x128xf32>
    %20 = arith.mulf %15, %19 : vector<4x64x128xf32>
    %21 = vector.shape_cast %20 : vector<4x64x128xf32> to vector<2x2x64x128xf32>
    %c0_16 = arith.constant 0 : index
    %c0_17 = arith.constant 0 : index
    %c0_18 = arith.constant 0 : index
    %c0_19 = arith.constant 0 : index
    %22 = vector.load %arg6[%c0_16, %c0_17, %c0_18, %c0_19] : memref<2x2x64x128xf32, #tpu.memory_space<vmem>>, vector<2x2x64x128xf32>
    tpu.vector_store %arg6[%c0_16, %c0_17, %c0_18, %c0_19], %21 {strides = array<i32>} : memref<2x2x64x128xf32, #tpu.memory_space<vmem>>, vector<2x2x64x128xf32>,
    return
  }
  func.func @transform_0(%arg0: i32, %arg1: i32, %arg2: i32) -> (i32, i32, i32, i32) {
    %c0_i32 = arith.constant 0 : i32
    %c0_i32_0 = arith.constant 0 : i32
    return %arg0, %arg1, %c0_i32, %arg2 : i32, i32, i32, i32
  }
  func.func @transform_1(%arg0: i32, %arg1: i32, %arg2: i32) -> (i32, i32, i32, i32) {
    %c1_i32 = arith.constant 1 : i32
    %0 = arith.addi %c1_i32, %arg1 : i32
    %c0_i32 = arith.constant 0 : i32
    %c0_i32_0 = arith.constant 0 : i32
    %c0_i32_1 = arith.constant 0 : i32
    return %arg0, %0, %c0_i32, %c0_i32_0 : i32, i32, i32, i32
  }
  func.func @transform_2(%arg0: i32, %arg1: i32, %arg2: i32) -> (i32, i32, i32, i32) {
    %c2_i32 = arith.constant 2 : i32
    %0 = arith.addi %c2_i32, %arg1 : i32
    %c0_i32 = arith.constant 0 : i32
    %c0_i32_0 = arith.constant 0 : i32
    %c0_i32_1 = arith.constant 0 : i32
    return %arg0, %0, %c0_i32, %c0_i32_0 : i32, i32, i32, i32
  }
  func.func @transform_3(%arg0: i32, %arg1: i32, %arg2: i32) -> (i32, i32, i32, i32) {
    %c0_i32 = arith.constant 0 : i32
    %c0_i32_0 = arith.constant 0 : i32
    return %arg0, %arg1, %c0_i32, %arg2 : i32, i32, i32, i32
  }
}

</mosaic_0001>

<bundles_post_ra>
// kernel: tpu_custom_call.1
= control target key start
LH: loop header
LB: loop body
LE: loop exit
PB: predicated region body
PF: predicated region fallthrough
CT: control target
= control target key end

     0   :  { %8 = vsyncpa [#allocation3], 0  ;;  %s4482_s0 = inlined_call_operand.hbm [shape: f32[2,6,64,128], index: 0, kind: input, shape index: {}]   ;;  %s4483_s1 = inlined_call_operand.hbm [shape: f32[2,6,64,128], index: 1, kind: input, shape index: {}]   ;;  %s4484_s2 = inlined_call_operand.hbm [shape: f32[2,6,64,128], index: 2, kind: input, shape index: {}]   ;;  %s4485_s3 = inlined_call_operand.hbm [shape: f32[2,2,64,128], index: 3, kind: output, shape index: {}]  }
   0x1   :  { %9 = vsyncpa [#allocation6], 0 }
   0x2   :  { %10 = vsyncpa [#allocation4], 0 }
   0x3   :  { %s20_s12 = sld [smem:[#allocation0]]   ;;  %s3608_s13 = smov [#allocation2]  }
   0x4   :  { %s28_s14 = sshll.u32 %s3608_s13, 4  ;;  %s3609_s15 = smov 6144   ;;  %s29_s14 = int_to_ptr.vmem [resolvable:$true] %s28_s14 }
   0x5   :  { %35 = sst [smem:[#allocation10]] %s3609_s15  ;;  %s3610_s16 = smov 2048  }
   0x6   :  { %37 = sst [smem:[#allocation10 + $0x1]] %s3610_s16  ;;  %s3611_s17 = smov 16  }
   0x7   :  { %39 = sst [smem:[#allocation10 + $0x2]] %s3611_s17  ;;  %s3612_s19 = smov 128  }
   0x8   :  { %41 = sst [smem:[#allocation10 + $0x3]] %s3612_s19  ;;  %s3613_s21 = smov 8  }
   0x9   :  { %s2700_s18 = sshll.u32 %s20_s12, 26  ;;  %43 = sst [smem:[#allocation10 + $0x4]] %s3612_s19 }
   0xa   :  { %s2701_s20 = sadd.s32 134217728, %s2700_s18  ;;  %45 = sst [smem:[#allocation10 + $0x5]] %s3613_s21 }
   0xb   :  { %s3614_s22 = smov [#allocation3]   ;;  %s3615_s23 = smov 131072  }
   0xc   :  { %47 = dma.general %s4482_s0, 4096, %s29_s14, %s3614_s22, %s3615_s23, [#allocation10], %s2701_s20, 0  }
   0xd   :  { %s2698_s28 = scalar_lea.hbm %s4483_s1, 2048  ;;  %s62_s29 = sld [smem:[#allocation0]]  }
   0xe   :  { %s3616_s30 = smov [#allocation5]   ;;  %s3617_s5 = smov 6144  }
   0xf   :  { %s70_s4 = sshll.u32 %s3616_s30, 4  ;;  %77 = sst [smem:[#allocation12]] %s3617_s5  ;;  %s71_s4 = int_to_ptr.vmem [resolvable:$true] %s70_s4 }
  0x10   :  { %s3618_s6 = smov 2048   ;;  %s3619_s7 = smov 16  }
  0x11   :  { %79 = sst [smem:[#allocation12 + $0x1]] %s3618_s6  ;;  %s3620_s9 = smov 128  }
  0x12   :  { %81 = sst [smem:[#allocation12 + $0x2]] %s3619_s7  ;;  %s3621_s0 = smov 8  }
  0x13   :  { %s2702_s8 = sshll.u32 %s62_s29, 26  ;;  %83 = sst [smem:[#allocation12 + $0x3]] %s3620_s9 }
  0x14   :  { %s2703_s10 = sadd.s32 134217728, %s2702_s8  ;;  %85 = sst [smem:[#allocation12 + $0x4]] %s3620_s9 }
  0x15   :  { %87 = sst [smem:[#allocation12 + $0x5]] %s3621_s0  ;;  %s3622_s11 = smov [#allocation6]  }
  0x16   :  { %s3623_s12 = smov 131072  }
  0x17   :  { %89 = dma.general %s2698_s28, 4096, %s71_s4, %s3622_s11, %s3623_s12, [#allocation12], %s2703_s10, 0  }
  0x18   :  { %s2699_s14 = scalar_lea.hbm %s4484_s2, 4096  ;;  %s104_s15 = sld [smem:[#allocation0]]  }
  0x19   :  { %s3624_s16 = smov [#allocation7]   ;;  %s3625_s18 = smov 6144  }
  0x1a   :  { %s112_s17 = sshll.u32 %s3624_s16, 4  ;;  %119 = sst [smem:[#allocation14]] %s3625_s18  ;;  %s113_s17 = int_to_ptr.vmem [resolvable:$true] %s112_s17 }
  0x1b   :  { %s3626_s19 = smov 2048   ;;  %s3627_s20 = smov 16  }
  0x1c   :  { %121 = sst [smem:[#allocation14 + $0x1]] %s3626_s19  ;;  %s3628_s22 = smov 128  }
  0x1d   :  { %123 = sst [smem:[#allocation14 + $0x2]] %s3627_s20  ;;  %s3629_s24 = smov 8  }
  0x1e   :  { %s2704_s21 = sshll.u32 %s104_s15, 26  ;;  %125 = sst [smem:[#allocation14 + $0x3]] %s3628_s22 }
  0x1f   :  { %s2705_s23 = sadd.s32 134217728, %s2704_s21  ;;  %127 = sst [smem:[#allocation14 + $0x4]] %s3628_s22 }
  0x20   :  { %129 = sst [smem:[#allocation14 + $0x5]] %s3629_s24  ;;  %s3630_s25 = smov [#allocation6]  }
  0x21   :  { %s3631_s26 = smov 131072  }
  0x22   :  { %131 = dma.general %s2699_s14, 4096, %s113_s17, %s3630_s25, %s3631_s26, [#allocation14], %s2705_s23, 0  }
  0x23   :  { %3602 = dma.done.wait [#allocation3], 4096  }
  0x24   :  { %3603 = vsyncadd [#allocation3], 4294963200 }
  0x25   :  { %3604 = dma.done.wait [#allocation6], 8192  }
  0x26   :  { %3605 = vsyncadd [#allocation6], 4294959104  ;;  %v153_v0 = vld [vmem:[#allocation2 + $0x40] sm:$0xff]  ;;  %v154_v2 = vld [vmem:[#allocation2 + $0x48] sm:$0xff]  ;;  %vm305_vm0 = vcmask 523264   ;;  %vm2245_vm1 = vcmask 130112  }
  0x27   :  { %v145_v1 = vld [vmem:[#allocation2] sm:$0xff]  ;;  %v185_v3 = vmul.f32 0.125, %v153_v0  ;;  %v146_v5 = vld [vmem:[#allocation2 + $0x8] sm:$0xff]  ;;  %v186_v6 = vmul.f32 0.125, %v154_v2  ;;  %v155_v8 = vld [vmem:[#allocation2 + $0x50] sm:$0xff]  ;;  %vm2252_vm2 = vcmask 195712  }
  0x28   :  { %v177_v4 = vmul.f32 0.125, %v145_v1  ;;  %v178_v7 = vmul.f32 0.125, %v146_v5  ;;  %v147_v9 = vld [vmem:[#allocation2 + $0x10] sm:$0xff]  ;;  %v187_v10 = vmul.f32 0.125, %v155_v8  ;;  %v156_v12 = vld [vmem:[#allocation2 + $0x58] sm:$0xff]  ;;  %v157_v20 = vld [vmem:[#allocation2 + $0x60] sm:$0xff] }
  0x29   :  { %499 = vxpose.xlu1.b32.start [1/8] (short) %v185_v3, 128  ;;  %v179_v11 = vmul.f32 0.125, %v147_v9  ;;  %v148_v13 = vld [vmem:[#allocation2 + $0x18] sm:$0xff]  ;;  %v188_v15 = vmul.f32 0.125, %v156_v12  ;;  %v215_v18 = vld [vmem:[#allocation5 + $0x30] sm:$0xff]  ;;  %v149_v21 = vld [vmem:[#allocation2 + $0x20] sm:$0xff]  ;;  %v189_v24 = vmul.f32 0.125, %v157_v20 }
  0x2a   :  { %273 = vxpose.xlu0.b32.start [1/8] (short) %v177_v4, 128  ;;  %v216_v14 = vld [vmem:[#allocation5 + $0x38] sm:$0xff]  ;;  %v180_v16 = vmul.f32 0.125, %v148_v13  ;;  %v223_v19 = vld [vmem:[#allocation5 + $0x70] sm:$0xff]  ;;  %v214_v22 = vld [vmem:[#allocation5 + $0x28] sm:$0xff]  ;;  %v181_v25 = vmul.f32 0.125, %v149_v21  ;;  %vm2259_vm3 = vcmask 261312  }
  0x2b   :  { %v224_v17 = vld [vmem:[#allocation5 + $0x78] sm:$0xff]  ;;  %2962 = vmatprep.subr.mxu0 %v216_v14  ;;  %v222_v23 = vld [vmem:[#allocation5 + $0x68] sm:$0xff]  ;;  %v213_v28 = vld [vmem:[#allocation5 + $0x20] sm:$0xff]  ;;  %vm2266_vm4 = vcmask 326912   ;;  %vm2273_vm5 = vcmask 392512   ;;  %vm2280_vm6 = vcmask 458112  }
  0x2c   :  { %3002 = vmatprep.subr.mxu1 %v224_v17  ;;  %2963 = vmatpush3.msra.mxu0 %v216_v14  ;;  %v158_v26 = vld [vmem:[#allocation2 + $0x68] sm:$0xff]  ;;  %v221_v29 = vld [vmem:[#allocation5 + $0x60] sm:$0xff]  ;;  %v212_v32 = vld [vmem:[#allocation5 + $0x18] sm:$0xff]  ;;  %vm2287_vm7 = vcmask 523712   ;;  %vm2294_vm8 = vcmask 589312   ;;  %vm2301_vm9 = vcmask 654912  }
  0x2d   :  { %500 = vxpose.xlu1.b32.cont [2/8] (short) %v186_v6, 128  ;;  %3003 = vmatpush3.msra.mxu1 %v224_v17  ;;  %v150_v27 = vld [vmem:[#allocation2 + $0x28] sm:$0xff]  ;;  %v190_v30 = vmul.f32 0.125, %v158_v26  ;;  %v220_v33 = vld [vmem:[#allocation5 + $0x58] sm:$0xff]  ;;  %v159_v34 = vld [vmem:[#allocation2 + $0x70] sm:$0xff]  ;;  %vm2308_vm10 = vcmask 720512   ;;  %vm2322_vm11 = vcmask 851712  }
  0x2e   :  { %274 = vxpose.xlu0.b32.cont [2/8] (short) %v178_v7, 128  ;;  %2964 = vmatprep.subr.mxu0 %v215_v18  ;;  %v182_v31 = vmul.f32 0.125, %v150_v27  ;;  %v151_v35 = vld [vmem:[#allocation2 + $0x30] sm:$0xff]  ;;  %v191_v38 = vmul.f32 0.125, %v159_v34  ;;  %v160_v40 = vld [vmem:[#allocation2 + $0x78] sm:$0xff]  ;;  %v210_v42 = vld [vmem:[#allocation5 + $0x8] sm:$0xff]  ;;  %vm2315_vm12 = vcmask 786112  }
  0x2f   :  { %3004 = vmatprep.subr.mxu1 %v223_v19  ;;  %2965 = vmatpush3.msra.mxu0 %v215_v18  ;;  %v211_v36 = vld [vmem:[#allocation5 + $0x10] sm:$0xff]  ;;  %v183_v39 = vmul.f32 0.125, %v151_v35  ;;  %v152_v41 = vld [vmem:[#allocation2 + $0x38] sm:$0xff]  ;;  %v218_v43 = vld [vmem:[#allocation5 + $0x48] sm:$0xff]  ;;  %v192_v44 = vmul.f32 0.125, %v160_v40  ;;  %vm2329_vm13 = vcmask 917312  }
  0x30   :  { %3005 = vmatpush3.msra.mxu1 %v223_v19  ;;  %2966 = vmatprep.subr.mxu0 %v214_v22  ;;  %v219_v37 = vld [vmem:[#allocation5 + $0x50] sm:$0xff]  ;;  %v184_v45 = vmul.f32 0.125, %v152_v41  ;;  %v209_v46 = vld [vmem:[#allocation5] sm:$0xff]  ;;  %v3664_v48 = vld [vmem:[#allocation5 + $0xb8] sm:$0xff]  ;;  %vm2336_vm14 = vcmask 982912   ;;  %vm2343_vm15 = vcmask 1048512  }
  0x31   :  { %501 = vxpose.xlu1.b32.cont [3/8] (short) %v187_v10, 128  ;;  %3006 = vmatprep.subr.mxu1 %v222_v23  ;;  %v217_v47 = vld [vmem:[#allocation5 + $0x40] sm:$0xff]  ;;  %v240_v49 = vld [vmem:[#allocation5 + $0xf8] sm:$0xff]  ;;  %v162_v54 = vld [vmem:[#allocation2 + $0x88] sm:$0xff]  ;;  %s3632_s2 = smov [#allocation8]  }
  0x32   :  { %275 = vxpose.xlu0.b32.cont [3/8] (short) %v179_v11, 128  ;;  %2967 = vmatpush3.msra.mxu0 %v214_v22  ;;  %v161_v50 = vld [vmem:[#allocation2 + $0x80] sm:$0xff]  ;;  %v170_v55 = vld [vmem:[#allocation2 + $0xc8] sm:$0xff]  ;;  %v194_v56 = vmul.f32 0.125, %v162_v54  ;;  %v163_v58 = vld [vmem:[#allocation2 + $0x90] sm:$0xff]  ;;  %s2685_s27 = sshll.u32 %s3632_s2, 4  ;;  %s2686_s27 = int_to_ptr.vmem [resolvable:$true] %s2685_s27 }
  0x33   :  { %3007 = vmatpush3.msra.mxu1 %v222_v23  ;;  %2968 = vmatprep.subr.mxu0 %v213_v28  ;;  %v169_v51 = vld [vmem:[#allocation2 + $0xc0] sm:$0xff]  ;;  %v193_v52 = vmul.f32 0.125, %v161_v50  ;;  %v202_v57 = vmul.f32 0.125, %v170_v55  ;;  %v171_v59 = vld [vmem:[#allocation2 + $0xd0] sm:$0xff]  ;;  %v195_v60 = vmul.f32 0.125, %v163_v58  ;;  %v164_v62 = vld [vmem:[#allocation2 + $0x98] sm:$0xff]  ;;  %p3587_p1 = scmp.lt.s32.totalorder %s2686_s27, %s2686_s27 }
  0x34   :  { %3008 = vmatprep.subr.mxu1 %v221_v29  ;;  %2969 = vmatpush3.msra.mxu0 %v213_v28  ;;  %v201_v53 = vmul.f32 0.125, %v169_v51  ;;  %v203_v61 = vmul.f32 0.125, %v171_v59  ;;  %v172_v63 = vld [vmem:[#allocation2 + $0xd8] sm:$0xff]  ;;  %v196_v0 = vmul.f32 0.125, %v164_v62  ;;  %v165_v2 = vld [vmem:[#allocation2 + $0xa0] sm:$0xff]  ;;  %v166_v6 = vld [vmem:[#allocation2 + $0xa8] sm:$0xff] }
  0x35   :  { %502 = vxpose.xlu1.b32.cont [4/8] (short) %v188_v15, 128  ;;  %3009 = vmatpush3.msra.mxu1 %v221_v29  ;;  %v204_v1 = vmul.f32 0.125, %v172_v63  ;;  %v173_v3 = vld [vmem:[#allocation2 + $0xe0] sm:$0xff]  ;;  %v197_v4 = vmul.f32 0.125, %v165_v2  ;;  %v174_v7 = vld [vmem:[#allocation2 + $0xe8] sm:$0xff]  ;;  %v198_v8 = vmul.f32 0.125, %v166_v6  ;;  %v167_v10 = vld [vmem:[#allocation2 + $0xb0] sm:$0xff] }
  0x36   :  { %276 = vxpose.xlu0.b32.cont [4/8] (short) %v180_v16, 128  ;;  %2970 = vmatprep.subr.mxu0 %v212_v32  ;;  %v205_v5 = vmul.f32 0.125, %v173_v3  ;;  %v206_v9 = vmul.f32 0.125, %v174_v7  ;;  %v175_v11 = vld [vmem:[#allocation2 + $0xf0] sm:$0xff]  ;;  %v199_v12 = vmul.f32 0.125, %v167_v10  ;;  %v168_v14 = vld [vmem:[#allocation2 + $0xb8] sm:$0xff]  ;;  %v229_v28 = vld [vmem:[#allocation5 + $0xa0] sm:$0xff] }
  0x37   :  { %3010 = vmatprep.subr.mxu1 %v220_v33  ;;  %2971 = vmatpush3.msra.mxu0 %v212_v32  ;;  %v207_v13 = vmul.f32 0.125, %v175_v11  ;;  %v176_v15 = vld [vmem:[#allocation2 + $0xf8] sm:$0xff]  ;;  %v200_v16 = vmul.f32 0.125, %v168_v14  ;;  %v231_v22 = vld [vmem:[#allocation5 + $0xb0] sm:$0xff]  ;;  %v237_v29 = vld [vmem:[#allocation5 + $0xe0] sm:$0xff]  ;;  %s3582_s28 = scalar_lea.vmem %s2686_s27, 4096 }
  0x38   :  { %3011 = vmatpush3.msra.mxu1 %v220_v33  ;;  %2972 = vmatprep.subr.mxu0 %v211_v36  ;;  %v208_v17 = vmul.f32 0.125, %v176_v15  ;;  %v239_v23 = vld [vmem:[#allocation5 + $0xf0] sm:$0xff]  ;;  %v228_v32 = vld [vmem:[#allocation5 + $0x98] sm:$0xff]  ;;  %p3583_p0 = scmp.ne.s32.totalorder %s2686_s27, %s3582_s28  ;;  %p3588_p2 = scmp.lt.s32.totalorder %s3582_s28, %s3582_s28 }
  0x39   :  { %503 = vxpose.xlu1.b32.cont [5/8] (short) %v189_v24, 128  ;;  %3012 = vmatprep.subr.mxu1 %v219_v37  ;;  %v230_v24 = vld [vmem:[#allocation5 + $0xa8] sm:$0xff]  ;;  %v236_v33 = vld [vmem:[#allocation5 + $0xd8] sm:$0xff]  ;;  %v227_v34 = vld [vmem:[#allocation5 + $0x90] sm:$0xff] }
  0x3a   :  { %277 = vxpose.xlu0.b32.cont [5/8] (short) %v181_v25, 128  ;;  %2973 = vmatpush3.msra.mxu0 %v211_v36  ;;  %v238_v25 = vld [vmem:[#allocation5 + $0xe8] sm:$0xff]  ;;  %v235_v35 = vld [vmem:[#allocation5 + $0xd0] sm:$0xff]  ;;  %p3589_p3 = por %p3588_p2, %p3587_p1 }
  0x3b   :  { %3013 = vmatpush3.msra.mxu1 %v219_v37  ;;  %2974 = vmatprep.subr.mxu0 %v210_v42 }
  0x3c   :  { %3014 = vmatprep.subr.mxu1 %v218_v43  ;;  %2975 = vmatpush3.msra.mxu0 %v210_v42  ;;  %v225_v42 = vld [vmem:[#allocation5 + $0x80] sm:$0xff]  ;;  %p3590_p4 = pnand %p3589_p3, %p3583_p0 }
  0x3d   :  { %504 = vxpose.xlu1.b32.cont [6/8] (short) %v190_v30, 128  ;;  %3015 = vmatpush3.msra.mxu1 %v218_v43  ;;  %v233_v43 = vld [vmem:[#allocation5 + $0xc0] sm:$0xff] }
  0x3e   :  { %278 = vxpose.xlu0.b32.cont [6/8] (short) %v182_v31, 128  ;;  %2976 = vmatprep.subr.mxu0 %v209_v46 }
  0x3f   :  { %3016 = vmatprep.subr.mxu1 %v217_v47  ;;  %2977 = vmatpush3.msra.mxu0 %v209_v46 }
  0x40   :  { %3017 = vmatpush3.msra.mxu1 %v217_v47  ;;  %3042 = vmatprep.subr.mxu0 %v3664_v48 }
  0x41   :  { %505 = vxpose.xlu1.b32.cont [7/8] (short) %v191_v38, 128  ;;  %3082 = vmatprep.subr.mxu1 %v240_v49  ;;  %v226_v38 = vld [vmem:[#allocation5 + $0x88] sm:$0xff] }
  0x42   :  { %279 = vxpose.xlu0.b32.cont [7/8] (short) %v183_v39, 128  ;;  %v234_v39 = vld [vmem:[#allocation5 + $0xc8] sm:$0xff] }
  0x45   :  { %506 = vxpose.xlu1.b32.end [8/8] (short) %v192_v44, 128 }
  0x46   :  { %280 = vxpose.xlu0.b32.end [8/8] (short) %v184_v45, 128 }
  0x66   :  { %949 = vxpose.xlu1.b32.start [1/8] (short) %v201_v53, 128 }
  0x67   :  { %724 = vxpose.xlu0.b32.start [1/8] (short) %v193_v52, 128 }
  0x6a   :  { %950 = vxpose.xlu1.b32.cont [2/8] (short) %v202_v57, 128 }
  0x6b   :  { %725 = vxpose.xlu0.b32.cont [2/8] (short) %v194_v56, 128 }
  0x6e   :  { %951 = vxpose.xlu1.b32.cont [3/8] (short) %v203_v61, 128 }
  0x6f   :  { %726 = vxpose.xlu0.b32.cont [3/8] (short) %v195_v60, 128 }
  0x72   :  { %952 = vxpose.xlu1.b32.cont [4/8] (short) %v204_v1, 128 }
  0x73   :  { %727 = vxpose.xlu0.b32.cont [4/8] (short) %v196_v0, 128 }
  0x76   :  { %953 = vxpose.xlu1.b32.cont [5/8] (short) %v205_v5, 128 }
  0x77   :  { %728 = vxpose.xlu0.b32.cont [5/8] (short) %v197_v4, 128 }
  0x7a   :  { %954 = vxpose.xlu1.b32.cont [6/8] (short) %v206_v9, 128 }
  0x7b   :  { %729 = vxpose.xlu0.b32.cont [6/8] (short) %v198_v8, 128 }
  0x7e   :  { %955 = vxpose.xlu1.b32.cont [7/8] (short) %v207_v13, 128 }
  0x7f   :  { %730 = vxpose.xlu0.b32.cont [7/8] (short) %v199_v12, 128 }
  0x82   :  { %956 = vxpose.xlu1.b32.end [8/8] (short) %v208_v17, 128 }
  0x83   :  { %731 = vxpose.xlu0.b32.end [8/8] (short) %v200_v16, 128 }
  0xa5   :  { %v515_v18 = vpop.trf.xlu1 }
  0xa6   :  { %v289_v19 = vpop.trf.xlu0  ;;  %3018 = vmatprep.mubr.msk.f32.mxu1 %vm305_vm0, %v515_v18 }
  0xa7   :  { %2978 = vmatprep.mubr.msk.f32.mxu0 %vm305_vm0, %v289_v19 }
  0xa9   :  { %v516_v20 = vpop.trf.xlu1 }
  0xaa   :  { %v290_v21 = vpop.trf.xlu0  ;;  %3019 = vmatmul.mubr.msk.f32.vlgmr.msra.gmra.mxu1 %vm305_vm0, %v516_v20 }
  0xab   :  { %2979 = vmatmul.mubr.msk.f32.vlgmr.msra.gmra.mxu0 %vm305_vm0, %v290_v21  ;;  %3083 = vmatpush3.msra.mxu1 %v240_v49 }
  0xac   :  { %3043 = vmatpush3.msra.mxu0 %v3664_v48  ;;  %3084 = vmatprep.subr.mxu1 %v239_v23 }
  0xad   :  { %3044 = vmatprep.subr.mxu0 %v231_v22  ;;  %v517_v26 = vpop.trf.xlu1  ;;  %3085 = vmatpush3.msra.mxu1 %v239_v23 }
  0xae   :  { %v291_v27 = vpop.trf.xlu0  ;;  %3045 = vmatpush3.msra.mxu0 %v231_v22  ;;  %3021 = vmatprep.mubr.msk.f32.mxu1 %vm305_vm0, %v517_v26 }
  0xaf   :  { %2981 = vmatprep.mubr.msk.f32.mxu0 %vm305_vm0, %v291_v27  ;;  %3046 = vmatprep.subr.mxu0 %v230_v24 }
  0xb0   :  { %3086 = vmatprep.subr.mxu1 %v238_v25  ;;  %3047 = vmatpush3.msra.mxu0 %v230_v24 }
  0xb1   :  { %3087 = vmatpush3.msra.mxu1 %v238_v25  ;;  %v518_v30 = vpop.trf.xlu1  ;;  %3048 = vmatprep.subr.mxu0 %v229_v28 }
  0xb2   :  { %v292_v31 = vpop.trf.xlu0  ;;  %3088 = vmatprep.subr.mxu1 %v237_v29  ;;  %3022 = vmatmul.mubr.msk.f32.gmra.mxu1 %vm305_vm0, %v518_v30 }
  0xb3   :  { %2982 = vmatmul.mubr.msk.f32.gmra.mxu0 %vm305_vm0, %v292_v31  ;;  %3089 = vmatpush3.msra.mxu1 %v237_v29 }
  0xb4   :  { %3049 = vmatpush3.msra.mxu0 %v229_v28  ;;  %3090 = vmatprep.subr.mxu1 %v236_v33 }
  0xb5   :  { %3050 = vmatprep.subr.mxu0 %v228_v32  ;;  %v519_v36 = vpop.trf.xlu1  ;;  %3091 = vmatpush3.msra.mxu1 %v236_v33 }
  0xb6   :  { %v293_v37 = vpop.trf.xlu0  ;;  %3051 = vmatpush3.msra.mxu0 %v228_v32  ;;  %3024 = vmatprep.mubr.msk.f32.mxu1 %vm305_vm0, %v519_v36 }
  0xb7   :  { %2984 = vmatprep.mubr.msk.f32.mxu0 %vm305_vm0, %v293_v37  ;;  %3052 = vmatprep.subr.mxu0 %v227_v34 }
  0xb8   :  { %3092 = vmatprep.subr.mxu1 %v235_v35  ;;  %3053 = vmatpush3.msra.mxu0 %v227_v34 }
  0xb9   :  { %3093 = vmatpush3.msra.mxu1 %v235_v35  ;;  %v520_v40 = vpop.trf.xlu1  ;;  %3054 = vmatprep.subr.mxu0 %v226_v38 }
  0xba   :  { %v294_v41 = vpop.trf.xlu0  ;;  %3094 = vmatprep.subr.mxu1 %v234_v39  ;;  %3025 = vmatmul.mubr.msk.f32.gmra.mxu1 %vm305_vm0, %v520_v40 }
  0xbb   :  { %2985 = vmatmul.mubr.msk.f32.gmra.mxu0 %vm305_vm0, %v294_v41  ;;  %3095 = vmatpush3.msra.mxu1 %v234_v39 }
  0xbc   :  { %3055 = vmatpush3.msra.mxu0 %v226_v38  ;;  %3096 = vmatprep.subr.mxu1 %v233_v43 }
  0xbd   :  { %3056 = vmatprep.subr.mxu0 %v225_v42  ;;  %v521_v44 = vpop.trf.xlu1  ;;  %3097 = vmatpush3.msra.mxu1 %v233_v43 }
  0xbe   :  { %v295_v45 = vpop.trf.xlu0  ;;  %3057 = vmatpush3.msra.mxu0 %v225_v42  ;;  %3027 = vmatprep.mubr.msk.f32.mxu1 %vm305_vm0, %v521_v44 }
  0xbf   :  { %2987 = vmatprep.mubr.msk.f32.mxu0 %vm305_vm0, %v295_v45 }
  0xc1   :  { %v522_v46 = vpop.trf.xlu1 }
  0xc2   :  { %v296_v47 = vpop.trf.xlu0  ;;  %3028 = vmatmul.mubr.msk.f32.gmra.mxu1 %vm305_vm0, %v522_v46 }
  0xc3   :  { %2988 = vmatmul.mubr.msk.f32.gmra.mxu0 %vm305_vm0, %v296_v47 }
  0xc5   :  { %v523_v48 = vpop.trf.xlu1 }
  0xc6   :  { %v297_v49 = vpop.trf.xlu0  ;;  %3030 = vmatprep.mubr.msk.f32.mxu1 %vm305_vm0, %v523_v48 }
  0xc7   :  { %2990 = vmatprep.mubr.msk.f32.mxu0 %vm305_vm0, %v297_v49 }
  0xc9   :  { %v524_v50 = vpop.trf.xlu1 }
  0xca   :  { %v298_v51 = vpop.trf.xlu0  ;;  %3031 = vmatmul.mubr.msk.f32.gmra.mxu1 %vm305_vm0, %v524_v50 }
  0xcb   :  { %2991 = vmatmul.mubr.msk.f32.gmra.mxu0 %vm305_vm0, %v298_v51 }
  0xcd   :  { %v525_v52 = vpop.trf.xlu1 }
  0xce   :  { %v299_v53 = vpop.trf.xlu0  ;;  %3033 = vmatprep.mubr.msk.f32.mxu1 %vm305_vm0, %v525_v52 }
  0xcf   :  { %2993 = vmatprep.mubr.msk.f32.mxu0 %vm305_vm0, %v299_v53 }
  0xd1   :  { %v526_v54 = vpop.trf.xlu1 }
  0xd2   :  { %v300_v55 = vpop.trf.xlu0  ;;  %3034 = vmatmul.mubr.msk.f32.gmra.mxu1 %vm305_vm0, %v526_v54 }
  0xd3   :  { %2994 = vmatmul.mubr.msk.f32.gmra.mxu0 %vm305_vm0, %v300_v55 }
  0xd5   :  { %v527_v56 = vpop.trf.xlu1 }
  0xd6   :  { %v301_v57 = vpop.trf.xlu0  ;;  %3036 = vmatprep.mubr.msk.f32.mxu1 %vm305_vm0, %v527_v56 }
  0xd7   :  { %2996 = vmatprep.mubr.msk.f32.mxu0 %vm305_vm0, %v301_v57 }
  0xd9   :  { %v528_v58 = vpop.trf.xlu1 }
  0xda   :  { %v302_v59 = vpop.trf.xlu0  ;;  %3037 = vmatmul.mubr.msk.f32.gmra.mxu1 %vm305_vm0, %v528_v58 }
  0xdb   :  { %2997 = vmatmul.mubr.msk.f32.gmra.mxu0 %vm305_vm0, %v302_v59 }
  0xdd   :  { %v529_v60 = vpop.trf.xlu1 }
  0xde   :  { %v303_v61 = vpop.trf.xlu0  ;;  %3039 = vmatprep.mubr.msk.f32.mxu1 %vm305_vm0, %v529_v60 }
  0xdf   :  { %2999 = vmatprep.mubr.msk.f32.mxu0 %vm305_vm0, %v303_v61 }
  0xe1   :  { %v530_v62 = vpop.trf.xlu1 }
  0xe2   :  { %v304_v63 = vpop.trf.xlu0  ;;  %3040 = vmatmul.mubr.msk.f32.gmra.mxu1 %vm305_vm0, %v530_v62 }
  0xe3   :  { %3000 = vmatmul.mubr.msk.f32.gmra.mxu0 %vm305_vm0, %v304_v63 }
  0xe5   :  { %v965_v1 = vpop.trf.xlu1 }
  0xe6   :  { %v740_v0 = vpop.trf.xlu0  ;;  %3098 = vmatprep.mubr.msk.f32.mxu1 %vm305_vm0, %v965_v1 }
  0xe7   :  { %3058 = vmatprep.mubr.msk.f32.mxu0 %vm305_vm0, %v740_v0 }
  0xe9   :  { %v966_v3 = vpop.trf.xlu1 }
  0xea   :  { %v741_v2 = vpop.trf.xlu0  ;;  %3099 = vmatmul.mubr.msk.f32.vlgmr.msra.gmra.mxu1 %vm305_vm0, %v966_v3 }
  0xeb   :  { %3059 = vmatmul.mubr.msk.f32.vlgmr.msra.gmra.mxu0 %vm305_vm0, %v741_v2 }
  0xed   :  { %v967_v5 = vpop.trf.xlu1 }
  0xee   :  { %v742_v4 = vpop.trf.xlu0  ;;  %3101 = vmatprep.mubr.msk.f32.mxu1 %vm305_vm0, %v967_v5 }
  0xef   :  { %3061 = vmatprep.mubr.msk.f32.mxu0 %vm305_vm0, %v742_v4 }
  0xf1   :  { %v968_v7 = vpop.trf.xlu1 }
  0xf2   :  { %v743_v6 = vpop.trf.xlu0  ;;  %3102 = vmatmul.mubr.msk.f32.gmra.mxu1 %vm305_vm0, %v968_v7 }
  0xf3   :  { %3062 = vmatmul.mubr.msk.f32.gmra.mxu0 %vm305_vm0, %v743_v6 }
  0xf5   :  { %v969_v9 = vpop.trf.xlu1 }
  0xf6   :  { %v744_v8 = vpop.trf.xlu0  ;;  %3104 = vmatprep.mubr.msk.f32.mxu1 %vm305_vm0, %v969_v9 }
  0xf7   :  { %3064 = vmatprep.mubr.msk.f32.mxu0 %vm305_vm0, %v744_v8 }
  0xf9   :  { %v970_v11 = vpop.trf.xlu1 }
  0xfa   :  { %v745_v10 = vpop.trf.xlu0  ;;  %3105 = vmatmul.mubr.msk.f32.gmra.mxu1 %vm305_vm0, %v970_v11 }
  0xfb   :  { %3065 = vmatmul.mubr.msk.f32.gmra.mxu0 %vm305_vm0, %v745_v10 }
  0xfd   :  { %v971_v13 = vpop.trf.xlu1 }
  0xfe   :  { %v746_v12 = vpop.trf.xlu0  ;;  %3107 = vmatprep.mubr.msk.f32.mxu1 %vm305_vm0, %v971_v13 }
  0xff   :  { %3067 = vmatprep.mubr.msk.f32.mxu0 %vm305_vm0, %v746_v12 }
 0x101   :  { %v972_v15 = vpop.trf.xlu1 }
 0x102   :  { %v747_v14 = vpop.trf.xlu0  ;;  %3108 = vmatmul.mubr.msk.f32.gmra.mxu1 %vm305_vm0, %v972_v15 }
 0x103   :  { %3068 = vmatmul.mubr.msk.f32.gmra.mxu0 %vm305_vm0, %v747_v14 }
 0x105   :  { %v973_v17 = vpop.trf.xlu1 }
 0x106   :  { %v748_v16 = vpop.trf.xlu0  ;;  %3110 = vmatprep.mubr.msk.f32.mxu1 %vm305_vm0, %v973_v17 }
 0x107   :  { %3070 = vmatprep.mubr.msk.f32.mxu0 %vm305_vm0, %v748_v16 }
 0x109   :  { %v974_v19 = vpop.trf.xlu1 }
 0x10a   :  { %v749_v18 = vpop.trf.xlu0  ;;  %3111 = vmatmul.mubr.msk.f32.gmra.mxu1 %vm305_vm0, %v974_v19 }
 0x10b   :  { %3071 = vmatmul.mubr.msk.f32.gmra.mxu0 %vm305_vm0, %v749_v18 }
 0x10d   :  { %v975_v21 = vpop.trf.xlu1 }
 0x10e   :  { %v750_v20 = vpop.trf.xlu0  ;;  %3113 = vmatprep.mubr.msk.f32.mxu1 %vm305_vm0, %v975_v21 }
 0x10f   :  { %3073 = vmatprep.mubr.msk.f32.mxu0 %vm305_vm0, %v750_v20 }
 0x111   :  { %v976_v23 = vpop.trf.xlu1 }
 0x112   :  { %v751_v22 = vpop.trf.xlu0  ;;  %3114 = vmatmul.mubr.msk.f32.gmra.mxu1 %vm305_vm0, %v976_v23 }
 0x113   :  { %3074 = vmatmul.mubr.msk.f32.gmra.mxu0 %vm305_vm0, %v751_v22 }
 0x115   :  { %v977_v25 = vpop.trf.xlu1 }
 0x116   :  { %v752_v24 = vpop.trf.xlu0  ;;  %3116 = vmatprep.mubr.msk.f32.mxu1 %vm305_vm0, %v977_v25 }
 0x117   :  { %3076 = vmatprep.mubr.msk.f32.mxu0 %vm305_vm0, %v752_v24 }
 0x119   :  { %v978_v27 = vpop.trf.xlu1 }
 0x11a   :  { %v753_v26 = vpop.trf.xlu0  ;;  %3117 = vmatmul.mubr.msk.f32.gmra.mxu1 %vm305_vm0, %v978_v27 }
 0x11b   :  { %3077 = vmatmul.mubr.msk.f32.gmra.mxu0 %vm305_vm0, %v753_v26 }
 0x11d   :  { %v979_v29 = vpop.trf.xlu1 }
 0x11e   :  { %v754_v28 = vpop.trf.xlu0  ;;  %3119 = vmatprep.mubr.msk.f32.mxu1 %vm305_vm0, %v979_v29 }
 0x11f   :  { %3079 = vmatprep.mubr.msk.f32.mxu0 %vm305_vm0, %v754_v28 }
 0x121   :  { %v980_v31 = vpop.trf.xlu1 }
 0x122   :  { %v755_v30 = vpop.trf.xlu0  ;;  %3120 = vmatmul.mubr.msk.f32.gmra.mxu1 %vm305_vm0, %v980_v31 }
 0x123   :  { %3080 = vmatmul.mubr.msk.f32.gmra.mxu0 %vm305_vm0, %v755_v30 }
 0x16a   :  { %v3734_v33 = vpop.f32.mrf.mxu1 }
 0x16b   :  { %v3732_v32 = vpop.f32.mrf.mxu0 }
 0x16c   :  { %v3738_v35 = vpop.f32.mrf.mxu1 }
 0x16d   :  { %v3736_v34 = vpop.f32.mrf.mxu0 }
 0x172   :  { %v3742_v37 = vpop.f32.mrf.mxu1 }
 0x173   :  { %v3740_v36 = vpop.f32.mrf.mxu0 }
 0x174   :  { %v3746_v39 = vpop.f32.mrf.mxu1 }
 0x175   :  { %v3744_v38 = vpop.f32.mrf.mxu0 }
 0x17a   :  { %v3750_v41 = vpop.f32.mrf.mxu1 }
 0x17b   :  { %v3748_v40 = vpop.f32.mrf.mxu0 }
 0x17c   :  { %v3754_v43 = vpop.f32.mrf.mxu1 }
 0x17d   :  { %v3752_v42 = vpop.f32.mrf.mxu0 }
 0x182   :  { %v3758_v45 = vpop.f32.mrf.mxu1 }
 0x183   :  { %v3756_v44 = vpop.f32.mrf.mxu0 }
 0x184   :  { %v3762_v47 = vpop.f32.mrf.mxu1 }
 0x185   :  { %v3760_v46 = vpop.f32.mrf.mxu0 }
 0x18a   :  { %v3766_v49 = vpop.f32.mrf.mxu1 }
 0x18b   :  { %v3764_v48 = vpop.f32.mrf.mxu0 }
 0x18c   :  { %v3770_v51 = vpop.f32.mrf.mxu1 }
 0x18d   :  { %v3768_v50 = vpop.f32.mrf.mxu0 }
 0x192   :  { %v3774_v53 = vpop.f32.mrf.mxu1 }
 0x193   :  { %v3772_v52 = vpop.f32.mrf.mxu0 }
 0x194   :  { %v3778_v55 = vpop.f32.mrf.mxu1 }
 0x195   :  { %v3776_v54 = vpop.f32.mrf.mxu0 }
 0x19a   :  { %v3782_v57 = vpop.f32.mrf.mxu1 }
 0x19b   :  { %v3780_v56 = vpop.f32.mrf.mxu0 }
 0x19c   :  { %v3786_v59 = vpop.f32.mrf.mxu1 }
 0x19d   :  { %v3784_v58 = vpop.f32.mrf.mxu0 }
 0x1a2   :  { %v3790_v61 = vpop.f32.mrf.mxu1 }
 0x1a3   :  { %v3788_v60 = vpop.f32.mrf.mxu0  ;;  %1236 = vmax.xlane.f32.xlu1 %v3790_v61 }
 0x1a4   :  { %1204 = vmax.xlane.f32.xlu0 %v3788_v60  ;;  %v3798_v63 = vpop.f32.mrf.mxu1 }
 0x1a5   :  { %v3794_v62 = vpop.f32.mrf.mxu0 }
 0x1a7   :  { %1202 = vmax.xlane.f32.xlu1 %v3794_v62 }
 0x1a8   :  { %1200 = vmax.xlane.f32.xlu0 %v3780_v56 }
 0x1aa   :  { %v3814_v2 = vpop.f32.mrf.mxu1 }
 0x1ab   :  { %1234 = vmax.xlane.f32.xlu1 %v3798_v63  ;;  %v3808_v0 = vpop.f32.mrf.mxu0  ;;  %4503 = vst [vmem:[#allocation20_spill] sm:$0xff] %v3814_v2 }
 0x1ac   :  { %1198 = vmax.xlane.f32.xlu0 %v3784_v58  ;;  %4501 = vst [vmem:[#allocation18_spill] sm:$0xff] %v3808_v0  ;;  %v3820_v4 = vpop.f32.mrf.mxu1 }
 0x1ad   :  { %v3812_v1 = vpop.f32.mrf.mxu0  ;;  %4505 = vst [vmem:[#allocation22_spill] sm:$0xff] %v3820_v4 }
 0x1ae   :  { %4502 = vst [vmem:[#allocation19_spill] sm:$0xff] %v3812_v1 }
 0x1af   :  { %1232 = vmax.xlane.f32.xlu1 %v3782_v57 }
 0x1b0   :  { %1196 = vmax.xlane.f32.xlu0 %v3772_v52 }
 0x1b2   :  { %v3824_v6 = vpop.f32.mrf.mxu1 }
 0x1b3   :  { %1230 = vmax.xlane.f32.xlu1 %v3786_v59  ;;  %v3816_v3 = vpop.f32.mrf.mxu0  ;;  %4507 = vst [vmem:[#allocation24_spill] sm:$0xff] %v3824_v6 }
 0x1b4   :  { %1194 = vmax.xlane.f32.xlu0 %v3776_v54  ;;  %4504 = vst [vmem:[#allocation21_spill] sm:$0xff] %v3816_v3  ;;  %v3830_v8 = vpop.f32.mrf.mxu1 }
 0x1b5   :  { %v3822_v5 = vpop.f32.mrf.mxu0  ;;  %4509 = vst [vmem:[#allocation26_spill] sm:$0xff] %v3830_v8 }
 0x1b6   :  { %4506 = vst [vmem:[#allocation23_spill] sm:$0xff] %v3822_v5 }
 0x1b7   :  { %1228 = vmax.xlane.f32.xlu1 %v3774_v53 }
 0x1b8   :  { %1192 = vmax.xlane.f32.xlu0 %v3764_v48 }
 0x1ba   :  { %v3836_v10 = vpop.f32.mrf.mxu1 }
 0x1bb   :  { %1226 = vmax.xlane.f32.xlu1 %v3778_v55  ;;  %v3828_v7 = vpop.f32.mrf.mxu0  ;;  %4511 = vst [vmem:[#allocation28_spill] sm:$0xff] %v3836_v10 }
 0x1bc   :  { %1190 = vmax.xlane.f32.xlu0 %v3768_v50  ;;  %4508 = vst [vmem:[#allocation25_spill] sm:$0xff] %v3828_v7  ;;  %v3842_v12 = vpop.f32.mrf.mxu1 }
 0x1bd   :  { %v3834_v9 = vpop.f32.mrf.mxu0  ;;  %4512 = vst [vmem:[#allocation29_spill] sm:$0xff] %v3842_v12 }
 0x1be   :  { %4510 = vst [vmem:[#allocation27_spill] sm:$0xff] %v3834_v9 }
 0x1bf   :  { %1224 = vmax.xlane.f32.xlu1 %v3766_v49 }
 0x1c0   :  { %1188 = vmax.xlane.f32.xlu0 %v3756_v44 }
 0x1c2   :  { %v3846_v14 = vpop.f32.mrf.mxu1 }
 0x1c3   :  { %1222 = vmax.xlane.f32.xlu1 %v3770_v51  ;;  %v3838_v11 = vpop.f32.mrf.mxu0 }
 0x1c4   :  { %1186 = vmax.xlane.f32.xlu0 %v3760_v46  ;;  %v3852_v16 = vpop.f32.mrf.mxu1 }
 0x1c5   :  { %v3844_v13 = vpop.f32.mrf.mxu0  ;;  %4513 = vst [vmem:[#allocation30_spill] sm:$0xff] %v3852_v16 }
 0x1c7   :  { %1220 = vmax.xlane.f32.xlu1 %v3758_v45 }
 0x1c8   :  { %1184 = vmax.xlane.f32.xlu0 %v3748_v40 }
 0x1ca   :  { %v3858_v18 = vpop.f32.mrf.mxu1 }
 0x1cb   :  { %1218 = vmax.xlane.f32.xlu1 %v3762_v47  ;;  %v3850_v15 = vpop.f32.mrf.mxu0 }
 0x1cc   :  { %1182 = vmax.xlane.f32.xlu0 %v3752_v42  ;;  %v3864_v20 = vpop.f32.mrf.mxu1 }
 0x1cd   :  { %v3856_v17 = vpop.f32.mrf.mxu0 }
 0x1cf   :  { %1216 = vmax.xlane.f32.xlu1 %v3750_v41 }
 0x1d0   :  { %1180 = vmax.xlane.f32.xlu0 %v3740_v36 }
 0x1d2   :  { %v3868_v22 = vpop.f32.mrf.mxu1 }
 0x1d3   :  { %1214 = vmax.xlane.f32.xlu1 %v3754_v43  ;;  %v3860_v19 = vpop.f32.mrf.mxu0 }
 0x1d4   :  { %1178 = vmax.xlane.f32.xlu0 %v3744_v38  ;;  %v3874_v24 = vpop.f32.mrf.mxu1 }
 0x1d5   :  { %v3866_v21 = vpop.f32.mrf.mxu0 }
 0x1d7   :  { %1212 = vmax.xlane.f32.xlu1 %v3742_v37 }
 0x1d8   :  { %1176 = vmax.xlane.f32.xlu0 %v3732_v32 }
 0x1da   :  { %v3879_v26 = vpop.f32.mrf.mxu1 }
 0x1db   :  { %1210 = vmax.xlane.f32.xlu1 %v3746_v39  ;;  %v3872_v23 = vpop.f32.mrf.mxu0 }
 0x1dc   :  { %1174 = vmax.xlane.f32.xlu0 %v3736_v34  ;;  %4514 = vst [vmem:[#allocation31_spill] sm:$0xff] %v3872_v23  ;;  %v3885_v28 = vpop.f32.mrf.mxu1 }
 0x1dd   :  { %v3877_v25 = vpop.f32.mrf.mxu0  ;;  %4515 = vst [vmem:[#allocation32_spill] sm:$0xff] %v3885_v28 }
 0x1df   :  { %1208 = vmax.xlane.f32.xlu1 %v3734_v33 }
 0x1e2   :  { %v3889_v30 = vpop.f32.mrf.mxu1 }
 0x1e3   :  { %v3881_v27 = vpop.f32.mrf.mxu0  ;;  %1206 = vmax.xlane.f32.xlu1 %v3738_v35 }
 0x1e4   :  { %1268 = vmax.xlane.f32.xlu0 %v3881_v27  ;;  %v3893_v31 = vpop.f32.mrf.mxu1 }
 0x1e5   :  { %v3887_v29 = vpop.f32.mrf.mxu0 }
 0x1e7   :  { %1300 = vmax.xlane.f32.xlu1 %v3889_v30 }
 0x1e8   :  { %1266 = vmax.xlane.f32.xlu0 %v3887_v29 }
 0x1eb   :  { %1298 = vmax.xlane.f32.xlu1 %v3893_v31 }
 0x1ec   :  { %1264 = vmax.xlane.f32.xlu0 %v3872_v23  ;;  %v241_v23 = vld [vmem:[#allocation7] sm:$0xff] }
 0x1ed   :  { %3154 = vmatprep.mubr.f32.mxu0 %v241_v23 }
 0x1ef   :  { %1296 = vmax.xlane.f32.xlu1 %v3879_v26 }
 0x1f0   :  { %1262 = vmax.xlane.f32.xlu0 %v3877_v25 }
 0x1f3   :  { %1294 = vmax.xlane.f32.xlu1 %v3885_v28  ;;  %v249_v28 = vld [vmem:[#allocation7 + $0x40] sm:$0xff] }
 0x1f4   :  { %1260 = vmax.xlane.f32.xlu0 %v3860_v19  ;;  %3198 = vmatprep.mubr.f32.mxu1 %v249_v28 }
 0x1f7   :  { %1292 = vmax.xlane.f32.xlu1 %v3868_v22 }
 0x1f8   :  { %1258 = vmax.xlane.f32.xlu0 %v3866_v21 }
 0x1fb   :  { %1290 = vmax.xlane.f32.xlu1 %v3874_v24 }
 0x1fc   :  { %1256 = vmax.xlane.f32.xlu0 %v3850_v15 }
 0x1ff   :  { %1288 = vmax.xlane.f32.xlu1 %v3858_v18 }
 0x200   :  { %1254 = vmax.xlane.f32.xlu0 %v3856_v17 }
 0x203   :  { %1286 = vmax.xlane.f32.xlu1 %v3864_v20 }
 0x204   :  { %1252 = vmax.xlane.f32.xlu0 %v3838_v11 }
 0x207   :  { %1284 = vmax.xlane.f32.xlu1 %v3846_v14 }
 0x208   :  { %1250 = vmax.xlane.f32.xlu0 %v3844_v13 }
 0x20b   :  { %1282 = vmax.xlane.f32.xlu1 %v3852_v16 }
 0x20c   :  { %1248 = vmax.xlane.f32.xlu0 %v3828_v7 }
 0x20f   :  { %1280 = vmax.xlane.f32.xlu1 %v3836_v10 }
 0x210   :  { %1246 = vmax.xlane.f32.xlu0 %v3834_v9 }
 0x213   :  { %1278 = vmax.xlane.f32.xlu1 %v3842_v12 }
 0x214   :  { %1244 = vmax.xlane.f32.xlu0 %v3816_v3 }
 0x217   :  { %1276 = vmax.xlane.f32.xlu1 %v3824_v6 }
 0x218   :  { %1242 = vmax.xlane.f32.xlu0 %v3822_v5 }
 0x21b   :  { %1274 = vmax.xlane.f32.xlu1 %v3830_v8 }
 0x21c   :  { %1240 = vmax.xlane.f32.xlu0 %v3808_v0 }
 0x21f   :  { %1272 = vmax.xlane.f32.xlu1 %v3814_v2 }
 0x220   :  { %1238 = vmax.xlane.f32.xlu0 %v3812_v1 }
 0x223   :  { %1270 = vmax.xlane.f32.xlu1 %v3820_v4 }
 0x22c   :  { %v1237_v23 = vpop.xlane.xlu1 %1236 }
 0x22d   :  { %v1205_v28 = vpop.xlane.xlu0 %1204  ;;  %v1333_v12 = vsub.f32 %v3790_v61, %v1237_v23 }
 0x22e   :  { %v1317_v3 = vsub.f32 %v3788_v60, %v1205_v28 }
 0x22f   :  { %v1428_v9 = vmul.f32 1.442695, %v1333_v12 }
 0x230   :  { %v1396_v6 = vmul.f32 1.442695, %v1317_v3  ;;  %v1203_v10 = vpop.xlane.xlu1 %1202 }
 0x231   :  { %v1201_v5 = vpop.xlane.xlu0 %1200  ;;  %3326 = vpow2.f32 %v1428_v9  ;;  %v1316_v8 = vsub.f32 %v3794_v62, %v1203_v10 }
 0x232   :  { %v1315_v0 = vsub.f32 %v3780_v56, %v1201_v5  ;;  %3328 = vpow2.f32 %v1396_v6 }
 0x233   :  { %v1394_v2 = vmul.f32 1.442695, %v1316_v8 }
 0x234   :  { %v1392_v1 = vmul.f32 1.442695, %v1315_v0  ;;  %v1235_v7 = vpop.xlane.xlu1 %1234 }
 0x235   :  { %v1199_v4 = vpop.xlane.xlu0 %1198  ;;  %3330 = vpow2.f32 %v1394_v2  ;;  %v1332_v16 = vsub.f32 %v3798_v63, %v1235_v7 }
 0x236   :  { %v1314_v61 = vsub.f32 %v3784_v58, %v1199_v4  ;;  %3332 = vpow2.f32 %v1392_v1 }
 0x237   :  { %v1426_v60 = vmul.f32 1.442695, %v1332_v16 }
 0x238   :  { %v1390_v3 = vmul.f32 1.442695, %v1314_v61  ;;  %v1233_v12 = vpop.xlane.xlu1 %1232 }
 0x239   :  { %v1197_v23 = vpop.xlane.xlu0 %1196  ;;  %3334 = vpow2.f32 %v1426_v60  ;;  %v1331_v62 = vsub.f32 %v3782_v57, %v1233_v12 }
 0x23a   :  { %v1313_v56 = vsub.f32 %v3772_v52, %v1197_v23  ;;  %3336 = vpow2.f32 %v1390_v3 }
 0x23b   :  { %v1424_v5 = vmul.f32 1.442695, %v1331_v62 }
 0x23c   :  { %v1388_v0 = vmul.f32 1.442695, %v1313_v56  ;;  %v1231_v6 = vpop.xlane.xlu1 %1230 }
 0x23d   :  { %v1195_v8 = vpop.xlane.xlu0 %1194  ;;  %3338 = vpow2.f32 %v1424_v5  ;;  %v1330_v63 = vsub.f32 %v3786_v59, %v1231_v6 }
 0x23e   :  { %v1312_v58 = vsub.f32 %v3776_v54, %v1195_v8  ;;  %v3934_v2 = vpop.eup %3326  ;;  %3340 = vpow2.f32 %v1388_v0 }
 0x23f   :  { %v3936_v1 = vpop.eup %3328  ;;  %v1422_v4 = vmul.f32 1.442695, %v1330_v63  ;;  %3166 = vmatprep.subr.mxu1 %v3934_v2 }
 0x240   :  { %v1386_v57 = vmul.f32 1.442695, %v1312_v58  ;;  %3122 = vmatprep.subr.mxu0 %v3936_v1  ;;  %3167 = vmatpush3.xpose.msra.mxu1 %v3934_v2  ;;  %v1229_v52 = vpop.xlane.xlu1 %1228 }
 0x241   :  { %v1193_v7 = vpop.xlane.xlu0 %1192  ;;  %3342 = vpow2.f32 %v1422_v4  ;;  %v1329_v59 = vsub.f32 %v3774_v53, %v1229_v52  ;;  %3123 = vmatpush3.xpose.msra.mxu0 %v3936_v1 }
 0x242   :  { %v1311_v54 = vsub.f32 %v3764_v48, %v1193_v7  ;;  %v3944_v9 = vpop.eup %3330  ;;  %3344 = vpow2.f32 %v1386_v57 }
 0x243   :  { %v1420_v10 = vmul.f32 1.442695, %v1329_v59  ;;  %3124 = vmatprep.subr.mxu0 %v3944_v9  ;;  %v3947_v60 = vpop.eup %3332 }
 0x244   :  { %v1384_v16 = vmul.f32 1.442695, %v1311_v54  ;;  %v1227_v28 = vpop.xlane.xlu1 %1226 }
 0x245   :  { %v1191_v61 = vpop.xlane.xlu0 %1190  ;;  %3346 = vpow2.f32 %v1420_v10  ;;  %v1328_v3 = vsub.f32 %v3778_v55, %v1227_v28  ;;  %3125 = vmatpush3.xpose.msra.mxu0 %v3944_v9 }
 0x246   :  { %v1310_v53 = vsub.f32 %v3768_v50, %v1191_v61  ;;  %v3952_v12 = vpop.eup %3334  ;;  %3126 = vmatprep.subr.mxu0 %v3947_v60  ;;  %3348 = vpow2.f32 %v1384_v16 }
 0x247   :  { %v1418_v48 = vmul.f32 1.442695, %v1328_v3  ;;  %3168 = vmatprep.subr.mxu1 %v3952_v12  ;;  %v3957_v5 = vpop.eup %3336 }
 0x248   :  { %v1382_v23 = vmul.f32 1.442695, %v1310_v53  ;;  %3169 = vmatpush3.xpose.msra.mxu1 %v3952_v12  ;;  %v1225_v62 = vpop.xlane.xlu1 %1224 }
 0x249   :  { %v1189_v56 = vpop.xlane.xlu0 %1188  ;;  %3350 = vpow2.f32 %v1418_v48  ;;  %v1327_v55 = vsub.f32 %v3766_v49, %v1225_v62  ;;  %3127 = vmatpush3.xpose.msra.mxu0 %v3947_v60 }
 0x24a   :  { %v1309_v50 = vsub.f32 %v3756_v44, %v1189_v56  ;;  %v3962_v0 = vpop.eup %3338  ;;  %3128 = vmatprep.subr.mxu0 %v3957_v5  ;;  %3352 = vpow2.f32 %v1382_v23 }
 0x24b   :  { %v1416_v6 = vmul.f32 1.442695, %v1327_v55  ;;  %3170 = vmatprep.subr.mxu1 %v3962_v0  ;;  %v3967_v4 = vpop.eup %3340 }
 0x24c   :  { %v1380_v8 = vmul.f32 1.442695, %v1309_v50  ;;  %3171 = vmatpush3.xpose.msra.mxu1 %v3962_v0  ;;  %v1223_v63 = vpop.xlane.xlu1 %1222 }
 0x24d   :  { %v1187_v58 = vpop.xlane.xlu0 %1186  ;;  %3354 = vpow2.f32 %v1416_v6  ;;  %v1326_v49 = vsub.f32 %v3770_v51, %v1223_v63  ;;  %3129 = vmatpush3.xpose.msra.mxu0 %v3957_v5 }
 0x24e   :  { %v1308_v44 = vsub.f32 %v3760_v46, %v1187_v58  ;;  %v3972_v57 = vpop.eup %3342  ;;  %3130 = vmatprep.subr.mxu0 %v3967_v4  ;;  %3356 = vpow2.f32 %v1380_v8 }
 0x24f   :  { %v1414_v52 = vmul.f32 1.442695, %v1326_v49  ;;  %3172 = vmatprep.subr.mxu1 %v3972_v57  ;;  %v3977_v10 = vpop.eup %3344 }
 0x250   :  { %v1378_v7 = vmul.f32 1.442695, %v1308_v44  ;;  %3173 = vmatpush3.xpose.msra.mxu1 %v3972_v57  ;;  %v1221_v59 = vpop.xlane.xlu1 %1220 }
 0x251   :  { %v1185_v54 = vpop.xlane.xlu0 %1184  ;;  %3358 = vpow2.f32 %v1414_v52  ;;  %v1325_v51 = vsub.f32 %v3758_v45, %v1221_v59  ;;  %3131 = vmatpush3.xpose.msra.mxu0 %v3967_v4 }
 0x252   :  { %v1307_v46 = vsub.f32 %v3748_v40, %v1185_v54  ;;  %v3982_v16 = vpop.eup %3346  ;;  %3132 = vmatprep.subr.mxu0 %v3977_v10  ;;  %3360 = vpow2.f32 %v1378_v7 }
 0x253   :  { %v1412_v28 = vmul.f32 1.442695, %v1325_v51  ;;  %3174 = vmatprep.subr.mxu1 %v3982_v16  ;;  %v3987_v48 = vpop.eup %3348 }
 0x254   :  { %v1376_v61 = vmul.f32 1.442695, %v1307_v46  ;;  %3175 = vmatpush3.xpose.msra.mxu1 %v3982_v16  ;;  %v1219_v3 = vpop.xlane.xlu1 %1218 }
 0x255   :  { %v1183_v53 = vpop.xlane.xlu0 %1182  ;;  %3362 = vpow2.f32 %v1412_v28  ;;  %v1324_v45 = vsub.f32 %v3762_v47, %v1219_v3  ;;  %3133 = vmatpush3.xpose.msra.mxu0 %v3977_v10 }
 0x256   :  { %v1306_v40 = vsub.f32 %v3752_v42, %v1183_v53  ;;  %v3992_v23 = vpop.eup %3350  ;;  %3134 = vmatprep.subr.mxu0 %v3987_v48  ;;  %3364 = vpow2.f32 %v1376_v61 }
 0x257   :  { %v1410_v62 = vmul.f32 1.442695, %v1324_v45  ;;  %3176 = vmatprep.subr.mxu1 %v3992_v23  ;;  %v3997_v6 = vpop.eup %3352 }
 0x258   :  { %v1374_v56 = vmul.f32 1.442695, %v1306_v40  ;;  %3177 = vmatpush3.xpose.msra.mxu1 %v3992_v23  ;;  %v1217_v55 = vpop.xlane.xlu1 %1216 }
 0x259   :  { %v1181_v50 = vpop.xlane.xlu0 %1180  ;;  %3366 = vpow2.f32 %v1410_v62  ;;  %v1323_v47 = vsub.f32 %v3750_v41, %v1217_v55  ;;  %3135 = vmatpush3.xpose.msra.mxu0 %v3987_v48 }
 0x25a   :  { %v1305_v42 = vsub.f32 %v3740_v36, %v1181_v50  ;;  %v4002_v8 = vpop.eup %3354  ;;  %3136 = vmatprep.subr.mxu0 %v3997_v6  ;;  %3368 = vpow2.f32 %v1374_v56 }
 0x25b   :  { %v1408_v63 = vmul.f32 1.442695, %v1323_v47  ;;  %3178 = vmatprep.subr.mxu1 %v4002_v8  ;;  %v4007_v52 = vpop.eup %3356 }
 0x25c   :  { %v1372_v58 = vmul.f32 1.442695, %v1305_v42  ;;  %3179 = vmatpush3.xpose.msra.mxu1 %v4002_v8  ;;  %v1215_v49 = vpop.xlane.xlu1 %1214 }
 0x25d   :  { %v1179_v44 = vpop.xlane.xlu0 %1178  ;;  %3370 = vpow2.f32 %v1408_v63  ;;  %v1322_v41 = vsub.f32 %v3754_v43, %v1215_v49  ;;  %3137 = vmatpush3.xpose.msra.mxu0 %v3997_v6 }
 0x25e   :  { %v1304_v36 = vsub.f32 %v3744_v38, %v1179_v44  ;;  %v4012_v7 = vpop.eup %3358  ;;  %3138 = vmatprep.subr.mxu0 %v4007_v52  ;;  %3372 = vpow2.f32 %v1372_v58 }
 0x25f   :  { %v1406_v59 = vmul.f32 1.442695, %v1322_v41  ;;  %3180 = vmatprep.subr.mxu1 %v4012_v7  ;;  %v4017_v28 = vpop.eup %3360 }
 0x260   :  { %v1370_v54 = vmul.f32 1.442695, %v1304_v36  ;;  %3181 = vmatpush3.xpose.msra.mxu1 %v4012_v7  ;;  %v1213_v51 = vpop.xlane.xlu1 %1212 }
 0x261   :  { %v1177_v46 = vpop.xlane.xlu0 %1176  ;;  %3374 = vpow2.f32 %v1406_v59  ;;  %v1321_v43 = vsub.f32 %v3742_v37, %v1213_v51  ;;  %3139 = vmatpush3.xpose.msra.mxu0 %v4007_v52 }
 0x262   :  { %v1303_v38 = vsub.f32 %v3732_v32, %v1177_v46  ;;  %v4022_v61 = vpop.eup %3362  ;;  %3140 = vmatprep.subr.mxu0 %v4017_v28  ;;  %3376 = vpow2.f32 %v1370_v54 }
 0x263   :  { %v1404_v3 = vmul.f32 1.442695, %v1321_v43  ;;  %3182 = vmatprep.subr.mxu1 %v4022_v61  ;;  %v4027_v62 = vpop.eup %3364 }
 0x264   :  { %v1368_v53 = vmul.f32 1.442695, %v1303_v38  ;;  %3183 = vmatpush3.xpose.msra.mxu1 %v4022_v61  ;;  %v1211_v45 = vpop.xlane.xlu1 %1210 }
 0x265   :  { %v1175_v40 = vpop.xlane.xlu0 %1174  ;;  %3378 = vpow2.f32 %v1404_v3  ;;  %v1320_v37 = vsub.f32 %v3746_v39, %v1211_v45  ;;  %3141 = vmatpush3.xpose.msra.mxu0 %v4017_v28 }
 0x266   :  { %v1302_v32 = vsub.f32 %v3736_v34, %v1175_v40  ;;  %v4032_v56 = vpop.eup %3366  ;;  %3380 = vpow2.f32 %v1368_v53  ;;  %3142 = vmatprep.subr.mxu0 %v4027_v62 }
 0x267   :  { %v1402_v55 = vmul.f32 1.442695, %v1320_v37  ;;  %3184 = vmatprep.subr.mxu1 %v4032_v56  ;;  %v4037_v42 = vpop.eup %3368 }
 0x268   :  { %v1366_v50 = vmul.f32 1.442695, %v1302_v32  ;;  %3185 = vmatpush3.xpose.msra.mxu1 %v4032_v56  ;;  %v1209_v47 = vpop.xlane.xlu1 %1208 }
 0x269   :  { %3382 = vpow2.f32 %v1402_v55  ;;  %v1319_v39 = vsub.f32 %v3734_v33, %v1209_v47  ;;  %3143 = vmatpush3.xpose.msra.mxu0 %v4027_v62 }
 0x26a   :  { %v4041_v34 = vpop.eup %3370  ;;  %3384 = vpow2.f32 %v1366_v50  ;;  %3144 = vmatprep.subr.mxu0 %v4037_v42 }
 0x26b   :  { %v1400_v63 = vmul.f32 1.442695, %v1319_v39  ;;  %3186 = vmatprep.subr.mxu1 %v4041_v34  ;;  %v4046_v44 = vpop.eup %3372 }
 0x26c   :  { %3187 = vmatpush3.xpose.msra.mxu1 %v4041_v34  ;;  %v1207_v58 = vpop.xlane.xlu1 %1206 }
 0x26d   :  { %v1269_v49 = vpop.xlane.xlu0 %1268  ;;  %3386 = vpow2.f32 %v1400_v63  ;;  %v1318_v41 = vsub.f32 %v3738_v35, %v1207_v58  ;;  %3145 = vmatpush3.xpose.msra.mxu0 %v4037_v42 }
 0x26e   :  { %v1349_v33 = vsub.f32 %v3881_v27, %v1269_v49  ;;  %v4051_v36 = vpop.eup %3374  ;;  %3146 = vmatprep.subr.mxu0 %v4046_v44 }
 0x26f   :  { %v1398_v59 = vmul.f32 1.442695, %v1318_v41  ;;  %3188 = vmatprep.subr.mxu1 %v4051_v36  ;;  %v4056_v43 = vpop.eup %3376 }
 0x270   :  { %v1460_v54 = vmul.f32 1.442695, %v1349_v33  ;;  %3189 = vmatpush3.xpose.msra.mxu1 %v4051_v36  ;;  %v1301_v51 = vpop.xlane.xlu1 %1300 }
 0x271   :  { %v1267_v46 = vpop.xlane.xlu0 %1266  ;;  %3388 = vpow2.f32 %v1398_v59  ;;  %v1365_v35 = vsub.f32 %v3889_v30, %v1301_v51  ;;  %3147 = vmatpush3.xpose.msra.mxu0 %v4046_v44 }
 0x272   :  { %v1348_v27 = vsub.f32 %v3887_v29, %v1267_v46  ;;  %v4061_v38 = vpop.eup %3378  ;;  %3390 = vpow2.f32 %v1460_v54  ;;  %3148 = vmatprep.subr.mxu0 %v4056_v43  ;;  %v4516_v29 = vld [vmem:[#allocation31_spill] sm:$0xff]  ;;  %v4517_v46 = vld [vmem:[#allocation32_spill] sm:$0xff] }
 0x273   :  { %v3381_v3 = vpop.eup %3380  ;;  %v1492_v53 = vmul.f32 1.442695, %v1365_v35  ;;  %3190 = vmatprep.subr.mxu1 %v4061_v38 }
 0x274   :  { %v1458_v45 = vmul.f32 1.442695, %v1348_v27  ;;  %1496 = vadd.xlane.f32.xlu1 %v3381_v3  ;;  %3191 = vmatpush3.xpose.msra.mxu1 %v4061_v38  ;;  %v1299_v40 = vpop.xlane.xlu1 %1298 }
 0x275   :  { %v1265_v37 = vpop.xlane.xlu0 %1264  ;;  %3392 = vpow2.f32 %v1492_v53  ;;  %v1364_v30 = vsub.f32 %v3893_v31, %v1299_v40  ;;  %3149 = vmatpush3.xpose.msra.mxu0 %v4056_v43  ;;  %v243_v40 = vld [vmem:[#allocation7 + $0x10] sm:$0xff] }
 0x276   :  { %v1347_v32 = vsub.f32 %v4516_v29, %v1265_v37  ;;  %v4069_v55 = vpop.eup %3382  ;;  %3394 = vpow2.f32 %v1458_v45  ;;  %3150 = vmatprep.subr.mxu0 %v3381_v3 }
 0x277   :  { %v3385_v50 = vpop.eup %3384  ;;  %v1490_v47 = vmul.f32 1.442695, %v1364_v30  ;;  %3192 = vmatprep.subr.mxu1 %v4069_v55 }
 0x278   :  { %v1456_v39 = vmul.f32 1.442695, %v1347_v32  ;;  %1494 = vadd.xlane.f32.xlu0 %v3385_v50  ;;  %3193 = vmatpush3.xpose.msra.mxu1 %v4069_v55  ;;  %v1297_v63 = vpop.xlane.xlu1 %1296  ;;  %v250_v32 = vld [vmem:[#allocation7 + $0x48] sm:$0xff] }
 0x279   :  { %v1263_v58 = vpop.xlane.xlu0 %1262  ;;  %3396 = vpow2.f32 %v1490_v47  ;;  %v1363_v31 = vsub.f32 %v3879_v26, %v1297_v63  ;;  %3151 = vmatpush3.xpose.msra.mxu0 %v3381_v3  ;;  %v242_v3 = vld [vmem:[#allocation7 + $0x8] sm:$0xff]  ;;  %v251_v63 = vld [vmem:[#allocation7 + $0x50] sm:$0xff] }
 0x27a   :  { %v1346_v49 = vsub.f32 %v3877_v25, %v1263_v58  ;;  %v3387_v41 = vpop.eup %3386  ;;  %3398 = vpow2.f32 %v1456_v39  ;;  %3152 = vmatprep.subr.mxu0 %v3385_v50 }
 0x27b   :  { %v1488_v33 = vmul.f32 1.442695, %v1363_v31  ;;  %3194 = vmatprep.subr.mxu1 %v3387_v41  ;;  %1528 = vadd.xlane.f32.xlu1 %v3387_v41 }
 0x27c   :  { %v1454_v59 = vmul.f32 1.442695, %v1346_v49  ;;  %3195 = vmatpush3.xpose.msra.mxu1 %v3387_v41  ;;  %v1295_v54 = vpop.xlane.xlu1 %1294  ;;  %v252_v49 = vld [vmem:[#allocation7 + $0x58] sm:$0xff] }
 0x27d   :  { %v1261_v51 = vpop.xlane.xlu0 %1260  ;;  %3400 = vpow2.f32 %v1488_v33  ;;  %v1362_v35 = vsub.f32 %v4517_v46, %v1295_v54  ;;  %3153 = vmatpush3.xpose.msra.mxu0 %v3385_v50  ;;  %v253_v54 = vld [vmem:[#allocation7 + $0x60] sm:$0xff] }
 0x27e   :  { %v1345_v27 = vsub.f32 %v3860_v19, %v1261_v51  ;;  %v3389_v26 = vpop.eup %3388  ;;  %3402 = vpow2.f32 %v1454_v59  ;;  %v244_v59 = vld [vmem:[#allocation7 + $0x18] sm:$0xff] }
 0x27f   :  { %v4077_v25 = vpop.eup %3390  ;;  %v1486_v53 = vmul.f32 1.442695, %v1362_v35  ;;  %3196 = vmatprep.subr.mxu1 %v3389_v26  ;;  %1500 = vadd.xlane.f32.xlu1 %v4046_v44  ;;  %v254_v35 = vld [vmem:[#allocation7 + $0x68] sm:$0xff] }
 0x280   :  { %v1452_v45 = vmul.f32 1.442695, %v1345_v27  ;;  %1526 = vadd.xlane.f32.xlu0 %v3389_v26  ;;  %3210 = vmatprep.subr.mxu0 %v4077_v25  ;;  %v1293_v37 = vpop.xlane.xlu1 %1292 }
 0x281   :  { %v1259_v30 = vpop.xlane.xlu0 %1258  ;;  %3404 = vpow2.f32 %v1486_v53  ;;  %3197 = vmatpush3.xpose.msra.mxu1 %v3389_v26  ;;  %v1361_v19 = vsub.f32 %v3868_v22, %v1293_v37  ;;  %3155 = vmatmul.mubr.f32.vlgmr.msra.gmra.mxu0 %v242_v3 }
 0x282   :  { %v1344_v29 = vsub.f32 %v3866_v21, %v1259_v30  ;;  %v4083_v50 = vpop.eup %3392  ;;  %3211 = vmatpush3.xpose.msra.mxu0 %v4077_v25  ;;  %3157 = vmatprep.mubr.f32.mxu0 %v243_v40  ;;  %3406 = vpow2.f32 %v1452_v45  ;;  %v255_v45 = vld [vmem:[#allocation7 + $0x70] sm:$0xff]  ;;  %v256_v30 = vld [vmem:[#allocation7 + $0x78] sm:$0xff] }
 0x283   :  { %v4086_v44 = vpop.eup %3394  ;;  %v1484_v47 = vmul.f32 1.442695, %v1361_v19  ;;  %3254 = vmatprep.subr.mxu1 %v4083_v50  ;;  %1532 = vadd.xlane.f32.xlu1 %v4061_v38 }
 0x284   :  { %v1450_v39 = vmul.f32 1.442695, %v1344_v29  ;;  %3199 = vmatmul.mubr.f32.vlgmr.msra.gmra.mxu1 %v250_v32  ;;  %1498 = vadd.xlane.f32.xlu0 %v4056_v43  ;;  %v1291_v21 = vpop.xlane.xlu1 %1290  ;;  %v247_v32 = vld [vmem:[#allocation7 + $0x30] sm:$0xff] }
 0x285   :  { %v1257_v22 = vpop.xlane.xlu0 %1256  ;;  %3408 = vpow2.f32 %v1484_v47  ;;  %3212 = vmatprep.subr.mxu0 %v4086_v44  ;;  %3255 = vmatpush3.xpose.msra.mxu1 %v4083_v50  ;;  %v1360_v58 = vsub.f32 %v3874_v24, %v1291_v21 }
 0x286   :  { %v1343_v31 = vsub.f32 %v3850_v15, %v1257_v22  ;;  %v4095_v41 = vpop.eup %3396  ;;  %3410 = vpow2.f32 %v1450_v39  ;;  %3213 = vmatpush3.xpose.msra.mxu0 %v4086_v44  ;;  %3201 = vmatprep.mubr.f32.mxu1 %v251_v63  ;;  %v248_v39 = vld [vmem:[#allocation7 + $0x38] sm:$0xff] }
 0x287   :  { %v4098_v38 = vpop.eup %3398  ;;  %v1482_v43 = vmul.f32 1.442695, %v1360_v58  ;;  %3256 = vmatprep.subr.mxu1 %v4095_v41  ;;  %1504 = vadd.xlane.f32.xlu1 %v4027_v62  ;;  %v245_v62 = vld [vmem:[#allocation7 + $0x20] sm:$0xff] }
 0x288   :  { %v1448_v33 = vmul.f32 1.442695, %v1343_v31  ;;  %3202 = vmatmul.mubr.f32.gmra.mxu1 %v252_v49  ;;  %1530 = vadd.xlane.f32.xlu0 %v4069_v55  ;;  %v1289_v15 = vpop.xlane.xlu1 %1288 }
 0x289   :  { %v1255_v24 = vpop.xlane.xlu0 %1254  ;;  %3412 = vpow2.f32 %v1482_v43  ;;  %3214 = vmatprep.subr.mxu0 %v4098_v38  ;;  %3257 = vmatpush3.xpose.msra.mxu1 %v4095_v41  ;;  %v1359_v51 = vsub.f32 %v3858_v18, %v1289_v15  ;;  %v4519_v43 = vld [vmem:[#allocation25_spill] sm:$0xff] }
 0x28a   :  { %v1342_v46 = vsub.f32 %v3856_v17, %v1255_v24  ;;  %v4107_v27 = vpop.eup %3400  ;;  %3414 = vpow2.f32 %v1448_v33  ;;  %3158 = vmatmul.mubr.f32.gmra.mxu0 %v244_v59  ;;  %3204 = vmatprep.mubr.f32.mxu1 %v253_v54  ;;  %v246_v17 = vld [vmem:[#allocation7 + $0x28] sm:$0xff]  ;;  %v265_v59 = vld [vmem:[#allocation7 + $0xc0] sm:$0xff] }
 0x28b   :  { %v4109_v26 = vpop.eup %3402  ;;  %v1480_v55 = vmul.f32 1.442695, %v1359_v51  ;;  %3215 = vmatpush3.xpose.msra.mxu0 %v4098_v38  ;;  %3258 = vmatprep.subr.mxu1 %v4107_v27 }
 0x28c   :  { %v1446_v3 = vmul.f32 1.442695, %v1342_v46  ;;  %3205 = vmatmul.mubr.f32.gmra.mxu1 %v254_v35  ;;  %1536 = vadd.xlane.f32.xlu1 %v4041_v34  ;;  %v1287_v18 = vpop.xlane.xlu1 %1286 }
 0x28d   :  { %v1253_v53 = vpop.xlane.xlu0 %1252  ;;  %3416 = vpow2.f32 %v1480_v55  ;;  %1502 = vadd.xlane.f32.xlu0 %v4037_v42  ;;  %3160 = vmatprep.mubr.f32.mxu0 %v245_v62  ;;  %v1358_v40 = vsub.f32 %v3864_v20, %v1287_v18  ;;  %v4521_v62 = vld [vmem:[#allocation27_spill] sm:$0xff] }
 0x28e   :  { %v1341_v37 = vsub.f32 %v3838_v11, %v1253_v53  ;;  %v4117_v19 = vpop.eup %3404  ;;  %3418 = vpow2.f32 %v1446_v3  ;;  %3216 = vmatprep.subr.mxu0 %v4109_v26  ;;  %3259 = vmatpush3.xpose.msra.mxu1 %v4107_v27 }
 0x28f   :  { %v1478_v34 = vmul.f32 1.442695, %v1358_v40  ;;  %3161 = vmatmul.mubr.f32.gmra.mxu0 %v246_v17  ;;  %3207 = vmatprep.mubr.f32.mxu1 %v255_v45  ;;  %v4121_v47 = vpop.eup %3406  ;;  %v4522_v40 = vld [vmem:[#allocation29_spill] sm:$0xff] }
 0x290   :  { %v1444_v29 = vmul.f32 1.442695, %v1341_v37  ;;  %3217 = vmatpush3.xpose.msra.mxu0 %v4109_v26  ;;  %3208 = vmatmul.mubr.f32.gmra.mxu1 %v256_v30  ;;  %v1285_v20 = vpop.xlane.xlu1 %1284 }
 0x291   :  { %v1251_v11 = vpop.xlane.xlu0 %1250  ;;  %3420 = vpow2.f32 %v1478_v34  ;;  %3260 = vmatprep.subr.mxu1 %v4117_v19  ;;  %1508 = vadd.xlane.f32.xlu1 %v4007_v52  ;;  %v1357_v42 = vsub.f32 %v3846_v14, %v1285_v20 }
 0x292   :  { %v1340_v63 = vsub.f32 %v3844_v13, %v1251_v11  ;;  %v4128_v21 = vpop.eup %3408  ;;  %3422 = vpow2.f32 %v1444_v29  ;;  %1534 = vadd.xlane.f32.xlu0 %v4051_v36  ;;  %3163 = vmatprep.mubr.f32.mxu0 %v247_v32  ;;  %v257_v13 = vld [vmem:[#allocation7 + $0x80] sm:$0xff] }
 0x293   :  { %v4131_v22 = vpop.eup %3410  ;;  %3218 = vmatprep.subr.mxu0 %v4121_v47  ;;  %3261 = vmatpush3.xpose.msra.mxu1 %v4117_v19  ;;  %v1476_v58 = vmul.f32 1.442695, %v1357_v42  ;;  %v4518_v36 = vld [vmem:[#allocation30_spill] sm:$0xff]  ;;  %v4524_v42 = vld [vmem:[#allocation24_spill] sm:$0xff] }
 0x294   :  { %v1442_v31 = vmul.f32 1.442695, %v1340_v63  ;;  %3164 = vmatmul.mubr.f32.gmra.mxu0 %v248_v39  ;;  %3262 = vmatprep.subr.mxu1 %v4128_v21  ;;  %v1283_v14 = vpop.xlane.xlu1 %1282 }
 0x295   :  { %v1249_v52 = vpop.xlane.xlu0 %1248  ;;  %3424 = vpow2.f32 %v1476_v58  ;;  %3219 = vmatpush3.xpose.msra.mxu0 %v4121_v47  ;;  %1540 = vadd.xlane.f32.xlu1 %v4022_v61  ;;  %v1356_v49 = vsub.f32 %v4518_v36, %v1283_v14  ;;  %v4526_v36 = vld [vmem:[#allocation26_spill] sm:$0xff] }
 0x296   :  { %v1339_v33 = vsub.f32 %v4519_v43, %v1249_v52  ;;  %v4140_v54 = vpop.eup %3412  ;;  %3426 = vpow2.f32 %v1442_v31  ;;  %1506 = vadd.xlane.f32.xlu0 %v4017_v28  ;;  %3220 = vmatprep.subr.mxu0 %v4131_v22  ;;  %v4520_v28 = vld [vmem:[#allocation28_spill] sm:$0xff] }
 0x297   :  { %v4144_v15 = vpop.eup %3414  ;;  %3263 = vmatpush3.xpose.msra.mxu1 %v4128_v21  ;;  %v1474_v24 = vmul.f32 1.442695, %v1356_v49  ;;  %3242 = vmatprep.mubr.f32.mxu0 %v257_v13 }
 0x298   :  { %v1440_v51 = vmul.f32 1.442695, %v1339_v33  ;;  %3264 = vmatprep.subr.mxu1 %v4140_v54  ;;  %v1281_v61 = vpop.xlane.xlu1 %1280  ;;  %3286 = vmatprep.mubr.f32.mxu1 %v265_v59 }
 0x299   :  { %v1247_v46 = vpop.xlane.xlu0 %1246  ;;  %3428 = vpow2.f32 %v1474_v24  ;;  %3221 = vmatpush3.xpose.msra.mxu0 %v4131_v22  ;;  %1512 = vadd.xlane.f32.xlu1 %v3987_v48  ;;  %v1355_v35 = vsub.f32 %v4520_v28, %v1281_v61 }
 0x29a   :  { %v1338_v55 = vsub.f32 %v4521_v62, %v1247_v46  ;;  %v4152_v3 = vpop.eup %3416  ;;  %3430 = vpow2.f32 %v1440_v51  ;;  %1538 = vadd.xlane.f32.xlu0 %v4032_v56  ;;  %3222 = vmatprep.subr.mxu0 %v4144_v15  ;;  %v4523_v56 = vld [vmem:[#allocation21_spill] sm:$0xff]  ;;  %v4528_v46 = vld [vmem:[#allocation20_spill] sm:$0xff] }
 0x29b   :  { %v4156_v18 = vpop.eup %3418  ;;  %3265 = vmatpush3.xpose.msra.mxu1 %v4140_v54  ;;  %v1472_v17 = vmul.f32 1.442695, %v1355_v35 }
 0x29c   :  { %v1438_v53 = vmul.f32 1.442695, %v1338_v55  ;;  %3266 = vmatprep.subr.mxu1 %v4152_v3  ;;  %v1279_v48 = vpop.xlane.xlu1 %1278 }
 0x29d   :  { %v1245_v45 = vpop.xlane.xlu0 %1244  ;;  %3432 = vpow2.f32 %v1472_v17  ;;  %3223 = vmatpush3.xpose.msra.mxu0 %v4144_v15  ;;  %1544 = vadd.xlane.f32.xlu1 %v4002_v8  ;;  %v1354_v37 = vsub.f32 %v4522_v40, %v1279_v48  ;;  %v4530_v48 = vld [vmem:[#allocation22_spill] sm:$0xff] }
 0x29e   :  { %v1337_v30 = vsub.f32 %v4523_v56, %v1245_v45  ;;  %v4164_v34 = vpop.eup %3420  ;;  %3434 = vpow2.f32 %v1438_v53  ;;  %1510 = vadd.xlane.f32.xlu0 %v3997_v6  ;;  %3224 = vmatprep.subr.mxu0 %v4156_v18  ;;  %v4525_v6 = vld [vmem:[#allocation23_spill] sm:$0xff] }
 0x29f   :  { %v4168_v29 = vpop.eup %3422  ;;  %3267 = vmatpush3.xpose.msra.mxu1 %v4152_v3  ;;  %v1470_v32 = vmul.f32 1.442695, %v1354_v37 }
 0x2a0   :  { %v1436_v20 = vmul.f32 1.442695, %v1337_v30  ;;  %3268 = vmatprep.subr.mxu1 %v4164_v34  ;;  %v1277_v8 = vpop.xlane.xlu1 %1276 }
 0x2a1   :  { %v1243_v11 = vpop.xlane.xlu0 %1242  ;;  %3436 = vpow2.f32 %v1470_v32  ;;  %3225 = vmatpush3.xpose.msra.mxu0 %v4156_v18  ;;  %1516 = vadd.xlane.f32.xlu1 %v3967_v4  ;;  %v1353_v39 = vsub.f32 %v4524_v42, %v1277_v8  ;;  %v260_v8 = vld [vmem:[#allocation7 + $0x98] sm:$0xff] }
 0x2a2   :  { %v1336_v63 = vsub.f32 %v4525_v6, %v1243_v11  ;;  %v4176_v58 = vpop.eup %3424  ;;  %3438 = vpow2.f32 %v1436_v20  ;;  %1542 = vadd.xlane.f32.xlu0 %v4012_v7  ;;  %3226 = vmatprep.subr.mxu0 %v4168_v29  ;;  %v4527_v7 = vld [vmem:[#allocation18_spill] sm:$0xff]  ;;  %v266_v20 = vld [vmem:[#allocation7 + $0xc8] sm:$0xff]  ;;  %v268_v42 = vld [vmem:[#allocation7 + $0xd8] sm:$0xff] }
 0x2a3   :  { %v4180_v31 = vpop.eup %3426  ;;  %3269 = vmatpush3.xpose.msra.mxu1 %v4164_v34  ;;  %v1468_v14 = vmul.f32 1.442695, %v1353_v39  ;;  %v261_v11 = vld [vmem:[#allocation7 + $0xa0] sm:$0xff]  ;;  %v262_v6 = vld [vmem:[#allocation7 + $0xa8] sm:$0xff] }
 0x2a4   :  { %v1434_v52 = vmul.f32 1.442695, %v1336_v63  ;;  %3270 = vmatprep.subr.mxu1 %v4176_v58  ;;  %v1275_v4 = vpop.xlane.xlu1 %1274  ;;  %v269_v39 = vld [vmem:[#allocation7 + $0xe0] sm:$0xff]  ;;  %v263_v63 = vld [vmem:[#allocation7 + $0xb0] sm:$0xff] }
 0x2a5   :  { %v1241_v13 = vpop.xlane.xlu0 %1240  ;;  %3440 = vpow2.f32 %v1468_v14  ;;  %3227 = vmatpush3.xpose.msra.mxu0 %v4168_v29  ;;  %1548 = vadd.xlane.f32.xlu1 %v3982_v16  ;;  %v1352_v49 = vsub.f32 %v4526_v36, %v1275_v4  ;;  %v270_v14 = vld [vmem:[#allocation7 + $0xe8] sm:$0xff]  ;;  %v264_v4 = vld [vmem:[#allocation7 + $0xb8] sm:$0xff] }
 0x2a6   :  { %v1335_v43 = vsub.f32 %v4527_v7, %v1241_v13  ;;  %v4188_v33 = vpop.eup %3428  ;;  %3442 = vpow2.f32 %v1434_v52  ;;  %1514 = vadd.xlane.f32.xlu0 %v3977_v10  ;;  %3228 = vmatprep.subr.mxu0 %v4180_v31  ;;  %v4529_v10 = vld [vmem:[#allocation19_spill] sm:$0xff]  ;;  %v271_v52 = vld [vmem:[#allocation7 + $0xf0] sm:$0xff]  ;;  %v272_v13 = vld [vmem:[#allocation7 + $0xf8] sm:$0xff] }
 0x2a7   :  { %v4192_v59 = vpop.eup %3430  ;;  %3271 = vmatpush3.xpose.msra.mxu1 %v4176_v58  ;;  %v1466_v24 = vmul.f32 1.442695, %v1352_v49 }
 0x2a8   :  { %v1432_v51 = vmul.f32 1.442695, %v1335_v43  ;;  %3272 = vmatprep.subr.mxu1 %v4188_v33  ;;  %v1273_v16 = vpop.xlane.xlu1 %1272 }
 0x2a9   :  { %v1239_v61 = vpop.xlane.xlu0 %1238  ;;  %3444 = vpow2.f32 %v1466_v24  ;;  %3229 = vmatpush3.xpose.msra.mxu0 %v4180_v31  ;;  %1552 = vadd.xlane.f32.xlu1 %v3962_v0  ;;  %v1351_v28 = vsub.f32 %v4528_v46, %v1273_v16 }
 0x2aa   :  { %v1334_v35 = vsub.f32 %v4529_v10, %v1239_v61  ;;  %v4200_v62 = vpop.eup %3432  ;;  %3446 = vpow2.f32 %v1432_v51  ;;  %1546 = vadd.xlane.f32.xlu0 %v3992_v23  ;;  %3230 = vmatprep.subr.mxu0 %v4192_v59 }
 0x2ab   :  { %v4204_v55 = vpop.eup %3434  ;;  %3273 = vmatpush3.xpose.msra.mxu1 %v4188_v33  ;;  %v1464_v17 = vmul.f32 1.442695, %v1351_v28 }
 0x2ac   :  { %v1430_v53 = vmul.f32 1.442695, %v1334_v35  ;;  %3274 = vmatprep.subr.mxu1 %v4200_v62  ;;  %v1271_v0 = vpop.xlane.xlu1 %1270 }
 0x2ad   :  { %3448 = vpow2.f32 %v1464_v17  ;;  %3231 = vmatpush3.xpose.msra.mxu0 %v4192_v59  ;;  %1550 = vadd.xlane.f32.xlu1 %v3972_v57  ;;  %v1350_v45 = vsub.f32 %v4530_v48, %v1271_v0 }
 0x2ae   :  { %v4211_v40 = vpop.eup %3436  ;;  %3450 = vpow2.f32 %v1430_v53  ;;  %1520 = vadd.xlane.f32.xlu0 %v3947_v60  ;;  %3232 = vmatprep.subr.mxu0 %v4204_v55 }
 0x2af   :  { %v3439_v23 = vpop.eup %3438  ;;  %3275 = vmatpush3.xpose.msra.mxu1 %v4200_v62  ;;  %v1462_v37 = vmul.f32 1.442695, %v1350_v45 }
 0x2b0   :  { %3276 = vmatprep.subr.mxu1 %v4211_v40 }
 0x2b1   :  { %3452 = vpow2.f32 %v1462_v37  ;;  %3233 = vmatpush3.xpose.msra.mxu0 %v4204_v55  ;;  %1556 = vadd.xlane.f32.xlu1 %v3934_v2 }
 0x2b2   :  { %v3441_v57 = vpop.eup %3440  ;;  %1518 = vadd.xlane.f32.xlu0 %v3957_v5  ;;  %3234 = vmatprep.subr.mxu0 %v3439_v23 }
 0x2b3   :  { %v3443_v56 = vpop.eup %3442  ;;  %3277 = vmatpush3.xpose.msra.mxu1 %v4211_v40 }
 0x2b4   :  { %3278 = vmatprep.subr.mxu1 %v3441_v57 }
 0x2b5   :  { %3235 = vmatpush3.xpose.msra.mxu0 %v3439_v23  ;;  %1554 = vadd.xlane.f32.xlu1 %v3952_v12  ;;  %v259_v12 = vld [vmem:[#allocation7 + $0x90] sm:$0xff] }
 0x2b6   :  { %v3445_v60 = vpop.eup %3444  ;;  %1524 = vadd.xlane.f32.xlu0 %v3936_v1  ;;  %3236 = vmatprep.subr.mxu0 %v3443_v56  ;;  %v258_v1 = vld [vmem:[#allocation7 + $0x88] sm:$0xff] }
 0x2b7   :  { %v3447_v30 = vpop.eup %3446  ;;  %3279 = vmatpush3.xpose.msra.mxu1 %v3441_v57 }
 0x2b8   :  { %3280 = vmatprep.subr.mxu1 %v3445_v60 }
 0x2b9   :  { %3237 = vmatpush3.xpose.msra.mxu0 %v3443_v56  ;;  %1560 = vadd.xlane.f32.xlu1 %v3447_v30 }
 0x2ba   :  { %v3449_v2 = vpop.eup %3448  ;;  %1522 = vadd.xlane.f32.xlu0 %v3944_v9  ;;  %3238 = vmatprep.subr.mxu0 %v3447_v30  ;;  %v267_v9 = vld [vmem:[#allocation7 + $0xd0] sm:$0xff] }
 0x2bb   :  { %v3451_v5 = vpop.eup %3450  ;;  %3281 = vmatpush3.xpose.msra.mxu1 %v3445_v60 }
 0x2bc   :  { %3282 = vmatprep.subr.mxu1 %v3449_v2 }
 0x2bd   :  { %3239 = vmatpush3.xpose.msra.mxu0 %v3447_v30  ;;  %1592 = vadd.xlane.f32.xlu1 %v3449_v2 }
 0x2be   :  { %v3453_v32 = vpop.eup %3452  ;;  %1558 = vadd.xlane.f32.xlu0 %v3451_v5  ;;  %3240 = vmatprep.subr.mxu0 %v3451_v5 }
 0x2bf   :  { %3283 = vmatpush3.xpose.msra.mxu1 %v3449_v2 }
 0x2c0   :  { %3284 = vmatprep.subr.mxu1 %v3453_v32 }
 0x2c1   :  { %3241 = vmatpush3.xpose.msra.mxu0 %v3451_v5  ;;  %1596 = vadd.xlane.f32.xlu1 %v3441_v57 }
 0x2c2   :  { %1590 = vadd.xlane.f32.xlu0 %v3453_v32 }
 0x2c3   :  { %3285 = vmatpush3.xpose.msra.mxu1 %v3453_v32 }
 0x2c4   :  { %3243 = vmatmul.mubr.f32.vlgmr.msra.gmra.mxu0 %v258_v1 }
 0x2c5   :  { %1562 = vadd.xlane.f32.xlu1 %v3443_v56  ;;  %3245 = vmatprep.mubr.f32.mxu0 %v259_v12 }
 0x2c6   :  { %3287 = vmatmul.mubr.f32.vlgmr.msra.gmra.mxu1 %v266_v20  ;;  %1564 = vadd.xlane.f32.xlu0 %v3439_v23 }
 0x2c7   :  { %3289 = vmatprep.mubr.f32.mxu1 %v267_v9 }
 0x2c8   :  { %3246 = vmatmul.mubr.f32.gmra.mxu0 %v260_v8 }
 0x2c9   :  { %1600 = vadd.xlane.f32.xlu1 %v4200_v62  ;;  %3248 = vmatprep.mubr.f32.mxu0 %v261_v11 }
 0x2ca   :  { %3290 = vmatmul.mubr.f32.gmra.mxu1 %v268_v42  ;;  %1594 = vadd.xlane.f32.xlu0 %v3445_v60 }
 0x2cb   :  { %3292 = vmatprep.mubr.f32.mxu1 %v269_v39 }
 0x2cc   :  { %3249 = vmatmul.mubr.f32.gmra.mxu0 %v262_v6 }
 0x2cd   :  { %1566 = vadd.xlane.f32.xlu1 %v4204_v55  ;;  %3251 = vmatprep.mubr.f32.mxu0 %v263_v63 }
 0x2ce   :  { %3293 = vmatmul.mubr.f32.gmra.mxu1 %v270_v14  ;;  %1568 = vadd.xlane.f32.xlu0 %v4192_v59 }
 0x2cf   :  { %3295 = vmatprep.mubr.f32.mxu1 %v271_v52 }
 0x2d0   :  { %3252 = vmatmul.mubr.f32.gmra.mxu0 %v264_v4 }
 0x2d1   :  { %1604 = vadd.xlane.f32.xlu1 %v4176_v58 }
 0x2d2   :  { %3296 = vmatmul.mubr.f32.gmra.mxu1 %v272_v13  ;;  %1598 = vadd.xlane.f32.xlu0 %v4211_v40 }
 0x2d5   :  { %1570 = vadd.xlane.f32.xlu1 %v4180_v31 }
 0x2d6   :  { %1572 = vadd.xlane.f32.xlu0 %v4168_v29 }
 0x2d9   :  { %1608 = vadd.xlane.f32.xlu1 %v4152_v3 }
 0x2da   :  { %1602 = vadd.xlane.f32.xlu0 %v4188_v33 }
 0x2dd   :  { %1574 = vadd.xlane.f32.xlu1 %v4156_v18 }
 0x2de   :  { %1576 = vadd.xlane.f32.xlu0 %v4144_v15 }
 0x2e1   :  { %1612 = vadd.xlane.f32.xlu1 %v4128_v21 }
 0x2e2   :  { %1606 = vadd.xlane.f32.xlu0 %v4164_v34 }
 0x2e5   :  { %1578 = vadd.xlane.f32.xlu1 %v4131_v22 }
 0x2e6   :  { %1580 = vadd.xlane.f32.xlu0 %v4121_v47 }
 0x2e9   :  { %1616 = vadd.xlane.f32.xlu1 %v4107_v27 }
 0x2ea   :  { %1610 = vadd.xlane.f32.xlu0 %v4140_v54 }
 0x2ed   :  { %1614 = vadd.xlane.f32.xlu1 %v4117_v19 }
 0x2ee   :  { %1584 = vadd.xlane.f32.xlu0 %v4098_v38 }
 0x2f1   :  { %1618 = vadd.xlane.f32.xlu1 %v4095_v41 }
 0x2f2   :  { %1582 = vadd.xlane.f32.xlu0 %v4109_v26 }
 0x2f5   :  { %1620 = vadd.xlane.f32.xlu1 %v4083_v50 }
 0x2f6   :  { %1586 = vadd.xlane.f32.xlu0 %v4086_v44  ;;  %v2234_v44 = vlaneseq }
 0x2f8   :  { %v4250_v49 = vand.u32 127, %v2234_v44  ;;  %v4255_v59 = vshrl.u32 %v2234_v44, 7 }
 0x2fa   :  { %1588 = vadd.xlane.f32.xlu0 %v4077_v25  ;;  %v2247_v33 = vadd.s32 4294967280, %v4250_v49  ;;  %v2240_v24 = vadd.s32 4294967288, %v4250_v49  ;;  %v2254_v61 = vadd.s32 4294967272, %v4250_v49  ;;  %v4261_v10 = vsub.s32 %v4250_v49, %v4255_v59 }
 0x2fb   :  { %v2268_v55 = vadd.s32 4294967256, %v4250_v49  ;;  %v2261_v17 = vadd.s32 4294967264, %v4250_v49  ;;  %v2282_v30 = vadd.s32 4294967240, %v4250_v49  ;;  %v2275_v1 = vadd.s32 4294967248, %v4250_v49 }
 0x2fc   :  { %v4264_v62 = vsub.s32 %v2247_v33, %v4255_v59  ;;  %v4269_v0 = vsub.s32 %v2240_v24, %v4255_v59  ;;  %v4273_v23 = vsub.s32 %v2254_v61, %v4255_v59 }
 0x2fd   :  { %v1497_v21 = vpop.xlane.xlu1 %1496  ;;  %v4279_v5 = vsub.s32 %v2268_v55, %v4255_v59  ;;  %v4282_v32 = vsub.s32 %v2261_v17, %v4255_v59  ;;  %v4292_v4 = vsub.s32 %v2282_v30, %v4255_v59  ;;  %v2324_v30 = vadd.s32 4294967192, %v4250_v49 }
 0x301   :  { %v1495_v22 = vpop.xlane.xlu0 %1494 }
 0x304   :  { %v1529_v47 = vpop.xlane.xlu1 %1528 }
 0x308   :  { %v1501_v27 = vpop.xlane.xlu1 %1500 }
 0x309   :  { %v1527_v15 = vpop.xlane.xlu0 %1526 }
 0x30a   :  { %3454 = vrcp.f32 %v1527_v15 }
 0x30c   :  { %v1533_v54 = vpop.xlane.xlu1 %1532 }
 0x30d   :  { %v1499_v3 = vpop.xlane.xlu0 %1498 }
 0x310   :  { %v1505_v19 = vpop.xlane.xlu1 %1504 }
 0x311   :  { %v1531_v18 = vpop.xlane.xlu0 %1530 }
 0x312   :  { %3456 = vrcp.f32 %v1531_v18 }
 0x313   :  { %3458 = vrcp.f32 %v1529_v47  ;;  %v4296_v47 = vsub.s32 %v2275_v1, %v4255_v59 }
 0x314   :  { %3460 = vrcp.f32 %v1495_v22  ;;  %v2289_v22 = vadd.s32 4294967232, %v4250_v49 }
 0x315   :  { %v1537_v38 = vpop.xlane.xlu1 %1536  ;;  %3462 = vrcp.f32 %v1533_v54  ;;  %v2296_v54 = vadd.s32 4294967224, %v4250_v49 }
 0x316   :  { %v1503_v34 = vpop.xlane.xlu0 %1502 }
 0x317   :  { %v3455_v16 = vpop.eup %3454  ;;  %v4315_v33 = vsub.s32 %v2296_v54, %v4255_v59 }
 0x318   :  { %v2348_v48 = vrot.slane %v3455_v16, %v4261_v10 }
 0x31a   :  { %v1509_v41 = vpop.xlane.xlu1 %1508 }
 0x31b   :  { %v1535_v29 = vpop.xlane.xlu0 %1534 }
 0x31c   :  { %3464 = vrcp.f32 %v1535_v29 }
 0x31d   :  { %3466 = vrcp.f32 %v1499_v3 }
 0x31e   :  { %v1541_v26 = vpop.xlane.xlu1 %1540  ;;  %3468 = vrcp.f32 %v1497_v21 }
 0x31f   :  { %v1507_v58 = vpop.xlane.xlu0 %1506  ;;  %3470 = vrcp.f32 %v1537_v38  ;;  %v3457_v28 = vpop.eup %3456 }
 0x320   :  { %v3459_v35 = vpop.eup %3458  ;;  %v2357_v37 = vrot.slane %v3457_v28, %v4264_v62 }
 0x321   :  { %v3461_v53 = vpop.eup %3460  ;;  %v2352_v60 = vrot.slane %v3459_v35, %v4269_v0 }
 0x322   :  { %v4248_v50 = vpop.xlane.xlu1 %1512  ;;  %v3463_v40 = vpop.eup %3462  ;;  %v2239_v11 = vrot.slane %v3461_v53, %v4261_v10 }
 0x323   :  { %v1539_v25 = vpop.xlane.xlu0 %1538  ;;  %v2353_v20 = vsel %vm2245_vm1, %v2352_v60, %v2348_v48  ;;  %v2362_v14 = vrot.slane %v3463_v40, %v4273_v23 }
 0x324   :  { %3472 = vrcp.f32 %v1539_v25  ;;  %v2358_v42 = vsel %vm2252_vm2, %v2357_v37, %v2353_v20 }
 0x325   :  { %3474 = vrcp.f32 %v1503_v34  ;;  %v2363_v15 = vsel %vm2259_vm3, %v2362_v14, %v2358_v42 }
 0x326   :  { %v1545_v31 = vpop.xlane.xlu1 %1544  ;;  %3476 = vrcp.f32 %v1501_v27 }
 0x327   :  { %v1511_v36 = vpop.xlane.xlu0 %1510  ;;  %3478 = vrcp.f32 %v1541_v26 }
 0x329   :  { %v3465_v56 = vpop.eup %3464 }
 0x32a   :  { %v4252_v7 = vpop.xlane.xlu1 %1516  ;;  %v3467_v2 = vpop.eup %3466  ;;  %v2367_v39 = vrot.slane %v3465_v56, %v4282_v32  ;;  %v2310_v56 = vadd.s32 4294967208, %v4250_v49 }
 0x32b   :  { %v1543_v43 = vpop.xlane.xlu0 %1542  ;;  %v3469_v12 = vpop.eup %3468  ;;  %v2251_v52 = vrot.slane %v3467_v2, %v4264_v62 }
 0x32c   :  { %3480 = vrcp.f32 %v1543_v43  ;;  %v3471_v8 = vpop.eup %3470  ;;  %v2244_v21 = vrot.slane %v3469_v12, %v4269_v0  ;;  %v2368_v38 = vsel %vm2266_vm4, %v2367_v39, %v2363_v15  ;;  %v4350_v15 = vsub.s32 %v2310_v56, %v4255_v59 }
 0x32d   :  { %3482 = vrcp.f32 %v1507_v58  ;;  %v2372_v58 = vrot.slane %v3471_v8, %v4279_v5 }
 0x32e   :  { %v1549_v51 = vpop.xlane.xlu1 %1548  ;;  %3484 = vrcp.f32 %v1505_v19  ;;  %v2246_v18 = vsel %vm2245_vm1, %v2244_v21, %v2239_v11 }
 0x32f   :  { %v1515_v46 = vpop.xlane.xlu0 %1514  ;;  %3486 = vrcp.f32 %v1545_v31  ;;  %v2253_v26 = vsel %vm2252_vm2, %v2251_v52, %v2246_v18  ;;  %v4310_v31 = vsub.s32 %v2289_v22, %v4255_v59  ;;  %v2373_v24 = vsel %vm2273_vm5, %v2372_v58, %v2368_v38 }
 0x330   :  { %3488 = vrcp.f32 %v1511_v36  ;;  %v2303_v36 = vadd.s32 4294967216, %v4250_v49  ;;  %v2331_v22 = vadd.s32 4294967184, %v4250_v49 }
 0x331   :  { %v3473_v63 = vpop.eup %3472 }
 0x332   :  { %v1553_v45 = vpop.xlane.xlu1 %1552  ;;  %v3475_v13 = vpop.eup %3474  ;;  %v2377_v34 = vrot.slane %v3473_v63, %v4296_v47  ;;  %v4327_v37 = vsub.s32 %v2303_v36, %v4255_v59 }
 0x333   :  { %v1547_v57 = vpop.xlane.xlu0 %1546  ;;  %v3477_v27 = vpop.eup %3476 }
 0x334   :  { %3490 = vrcp.f32 %v1547_v57  ;;  %v3479_v19 = vpop.eup %3478  ;;  %v2258_v44 = vrot.slane %v3477_v27, %v4273_v23  ;;  %v2378_v28 = vsel %vm2280_vm6, %v2377_v34, %v2373_v24  ;;  %v4358_v34 = vsub.s32 %v2324_v30, %v4255_v59 }
 0x335   :  { %3492 = vrcp.f32 %v1509_v41  ;;  %v2382_v53 = vrot.slane %v3479_v19, %v4292_v4 }
 0x336   :  { %3494 = vrcp.f32 %v1549_v51  ;;  %v1551_v9 = vpop.xlane.xlu1 %1550  ;;  %v2317_v51 = vadd.s32 4294967200, %v4250_v49 }
 0x337   :  { %3496 = vrcp.f32 %v1551_v9  ;;  %v1521_v6 = vpop.xlane.xlu0 %1520  ;;  %v2383_v60 = vsel %vm2287_vm7, %v2382_v53, %v2378_v28 }
 0x338   :  { %3498 = vrcp.f32 %v1515_v46  ;;  %v2260_v46 = vsel %vm2259_vm3, %v2258_v44, %v2253_v26  ;;  %v4333_v2 = vsub.s32 %v2317_v51, %v4255_v59  ;;  %v4371_v51 = vsub.s32 %v2331_v22, %v4255_v59 }
 0x339   :  { %3500 = vrcp.f32 %v4248_v50  ;;  %v3481_v29 = vpop.eup %3480  ;;  %v2265_v50 = vrot.slane %v3475_v13, %v4282_v32 }
 0x33a   :  { %v1557_v3 = vpop.xlane.xlu1 %1556  ;;  %3502 = vrcp.f32 %v1553_v45  ;;  %v3483_v25 = vpop.eup %3482  ;;  %v2387_v35 = vrot.slane %v3481_v29, %v4310_v31 }
 0x33b   :  { %v1519_v41 = vpop.xlane.xlu0 %1518  ;;  %v3485_v43 = vpop.eup %3484  ;;  %v2267_v17 = vsel %vm2266_vm4, %v2265_v50, %v2260_v46  ;;  %v2279_v48 = vrot.slane %v3483_v25, %v4296_v47 }
 0x33c   :  { %3504 = vrcp.f32 %v1519_v41  ;;  %v3487_v61 = vpop.eup %3486  ;;  %v2272_v40 = vrot.slane %v3485_v43, %v4279_v5  ;;  %v2388_v9 = vsel %vm2294_vm8, %v2387_v35, %v2383_v60 }
 0x33d   :  { %3506 = vrcp.f32 %v4252_v7  ;;  %v3489_v55 = vpop.eup %3488 }
 0x33e   :  { %3508 = vrcp.f32 %v1557_v3  ;;  %v1555_v16 = vpop.xlane.xlu1 %1554  ;;  %v2274_v20 = vsel %vm2273_vm5, %v2272_v40, %v2267_v17  ;;  %v2293_v63 = vrot.slane %v3489_v55, %v4310_v31  ;;  %v2338_v3 = vadd.s32 4294967176, %v4250_v49 }
 0x33f   :  { %3510 = vrcp.f32 %v1555_v16  ;;  %v1525_v7 = vpop.xlane.xlu0 %1524  ;;  %v2281_v39 = vsel %vm2280_vm6, %v2279_v48, %v2274_v20 }
 0x340   :  { %3512 = vrcp.f32 %v1521_v6  ;;  %v2392_v6 = vrot.slane %v3487_v61, %v4315_v33  ;;  %v4375_v46 = vsub.s32 %v2338_v3, %v4255_v59 }
 0x341   :  { %v3491_v45 = vpop.eup %3490  ;;  %3514 = vrcp.f32 %v1525_v7  ;;  %v4343_v14 = vpop.f32.mrf.mxu0 }
 0x342   :  { %v3493_v57 = vpop.eup %3492  ;;  %v4335_v1 = vpop.xlane.xlu1 %1560  ;;  %v2397_v8 = vrot.slane %v3491_v45, %v4327_v37  ;;  %v2393_v54 = vsel %vm2301_vm9, %v2392_v6, %v2388_v9 }
 0x343   :  { %v3495_v12 = vpop.eup %3494  ;;  %v1523_v11 = vpop.xlane.xlu0 %1522  ;;  %v2286_v21 = vrot.slane %v3493_v57, %v4292_v4 }
 0x344   :  { %v3497_v42 = vpop.eup %3496  ;;  %3516 = vrcp.f32 %v1523_v11  ;;  %v4345_v52 = vpop.f32.mrf.mxu1  ;;  %v2398_v41 = vsel %vm2308_vm10, %v2397_v8, %v2393_v54  ;;  %v2402_v25 = vrot.slane %v3495_v12, %v4350_v15 }
 0x345   :  { %v3499_v13 = vpop.eup %3498  ;;  %v2288_v38 = vsel %vm2287_vm7, %v2286_v21, %v2281_v39  ;;  %v2407_v29 = vrot.slane %v3497_v42, %v4333_v2  ;;  %v4367_v44 = vpop.f32.mrf.mxu0  ;;  %3518 = vrcp.f32 %v4335_v1 }
 0x346   :  { %v3501_v27 = vpop.eup %3500  ;;  %v4354_v19 = vpop.xlane.xlu1 %1592  ;;  %v2295_v50 = vsel %vm2294_vm8, %v2293_v63, %v2288_v38  ;;  %v2307_v49 = vrot.slane %v3499_v13, %v4327_v37  ;;  %v2403_v61 = vsel %vm2315_vm12, %v2402_v25, %v2398_v41 }
 0x347   :  { %v1793_v18 = vpop.f32.mrf.mxu1  ;;  %v4362_v26 = vpop.xlane.xlu0 %1558  ;;  %v2300_v24 = vrot.slane %v3501_v27, %v4315_v33  ;;  %v2408_v17 = vsel %vm2322_vm11, %v2407_v29, %v2403_v61 }
 0x348   :  { %v3503_v58 = vpop.eup %3502 }
 0x349   :  { %v3203_v36 = vpop.f32.mrf.mxu1  ;;  %v3505_v43 = vpop.eup %3504  ;;  %v2302_v55 = vsel %vm2301_vm9, %v2300_v24, %v2295_v50  ;;  %v2412_v57 = vrot.slane %v3503_v58, %v4358_v34 }
 0x34a   :  { %v3507_v16 = vpop.eup %3506  ;;  %v3159_v28 = vpop.f32.mrf.mxu0  ;;  %v2309_v40 = vsel %vm2308_vm10, %v2307_v49, %v2302_v55  ;;  %v2321_v59 = vrot.slane %v3505_v43, %v4333_v2 }
 0x34b   :  { %v4377_v35 = vpop.xlane.xlu1 %1596  ;;  %v3509_v7 = vpop.eup %3508  ;;  %v2314_v60 = vrot.slane %v3507_v16, %v4350_v15  ;;  %v2413_v8 = vsel %vm2329_vm13, %v2412_v57, %v2408_v17 }
 0x34c   :  { %v4381_v53 = vpop.xlane.xlu0 %1590  ;;  %v1803_v48 = vpop.f32.mrf.mxu1  ;;  %v2422_v9 = vrot.slane %v3509_v7, %v4375_v46 }
 0x34d   :  { %v3511_v45 = vpop.eup %3510  ;;  %v1698_v56 = vpop.f32.mrf.mxu0  ;;  %v2316_v42 = vsel %vm2315_vm12, %v2314_v60, %v2309_v40  ;;  %3520 = vrcp.f32 %v4381_v53 }
 0x34e   :  { %v2417_v30 = vrot.slane %v3511_v45, %v4371_v51  ;;  %v3206_v12 = vpop.f32.mrf.mxu1  ;;  %v3513_v20 = vpop.eup %3512  ;;  %v2323_v21 = vsel %vm2322_vm11, %v2321_v59, %v2316_v42 }
 0x34f   :  { %v4390_v11 = vpop.xlane.xlu1 %1562  ;;  %v3162_v6 = vpop.f32.mrf.mxu0  ;;  %v2328_v3 = vrot.slane %v3513_v20, %v4358_v34 }
 0x350   :  { %v2418_v39 = vsel %vm2336_vm14, %v2417_v30, %v2413_v8  ;;  %v4394_v63 = vpop.xlane.xlu0 %1564  ;;  %v3515_v13 = vpop.eup %3514 }
 0x351   :  { %v2423_v22 = vsel %vm2343_vm15, %v2422_v9, %v2418_v39  ;;  %v1813_v27 = vpop.f32.mrf.mxu1  ;;  %v3517_v54 = vpop.eup %3516  ;;  %v2342_v61 = vrot.slane %v3515_v13, %v4375_v46  ;;  %v2330_v7 = vsel %vm2329_vm13, %v2328_v3, %v2323_v21 }
 0x352   :  { %v2625_v38 = vmul.f32 %v4345_v52, %v2423_v22  ;;  %v2624_v41 = vmul.f32 %v2423_v22, %v1793_v18  ;;  %v2627_v29 = vmul.f32 %v3203_v36, %v2423_v22  ;;  %v1708_v58 = vpop.f32.mrf.mxu0  ;;  %v2335_v50 = vrot.slane %v3517_v54, %v4371_v51 }
 0x353   :  { %v2626_v25 = vmul.f32 %v2423_v22, %v1803_v48  ;;  %v2629_v49 = vmul.f32 %v3206_v12, %v2423_v22  ;;  %v2628_v43 = vmul.f32 %v2423_v22, %v1813_v27  ;;  %v3209_v24 = vpop.f32.mrf.mxu1  ;;  %v1601_v16 = vpop.xlane.xlu1 %1600 }
 0x354   :  { %2657 = vst [vmem:[#allocation8 + $0x48] sm:$0xff] %v2625_v38  ;;  %2656 = vst [vmem:[#allocation8 + $0x40] sm:$0xff] %v2624_v41  ;;  %v2631_v55 = vmul.f32 %v3209_v24, %v2423_v22  ;;  %v1595_v17 = vpop.xlane.xlu0 %1594  ;;  %v2337_v52 = vsel %vm2336_vm14, %v2335_v50, %v2330_v7  ;;  %v3165_v18 = vpop.f32.mrf.mxu0 }
 0x355   :  { %2659 = vst [vmem:[#allocation8 + $0x58] sm:$0xff] %v2627_v29  ;;  %2658 = vst [vmem:[#allocation8 + $0x50] sm:$0xff] %v2626_v25  ;;  %v1823_v36 = vpop.f32.mrf.mxu1  ;;  %v2344_v48 = vsel %vm2343_vm15, %v2342_v61, %v2337_v52  ;;  %3522 = vrcp.f32 %v1595_v17  ;;  %v3519_v27 = vpop.eup %3518 }
 0x356   :  { %2661 = vst [vmem:[#allocation8 + $0x68] sm:$0xff] %v2629_v49  ;;  %2660 = vst [vmem:[#allocation8 + $0x60] sm:$0xff] %v2628_v43  ;;  %v2630_v45 = vmul.f32 %v2423_v22, %v1823_v36  ;;  %v2617_v40 = vmul.f32 %v4343_v14, %v2344_v48  ;;  %v2616_v57 = vmul.f32 %v2344_v48, %v4367_v44  ;;  %v1718_v60 = vpop.f32.mrf.mxu0  ;;  %3524 = vrcp.f32 %v4354_v19 }
 0x357   :  { %2663 = vst [vmem:[#allocation8 + $0x78] sm:$0xff] %v2631_v55  ;;  %v2619_v59 = vmul.f32 %v3159_v28, %v2344_v48  ;;  %v1567_v30 = vpop.xlane.xlu1 %1566  ;;  %v2618_v12 = vmul.f32 %v2344_v48, %v1698_v56  ;;  %v2621_v20 = vmul.f32 %v3162_v6, %v2344_v48  ;;  %v2620_v9 = vmul.f32 %v2344_v48, %v1708_v58 }
 0x358   :  { %v2623_v8 = vmul.f32 %v3165_v18, %v2344_v48  ;;  %2662 = vst [vmem:[#allocation8 + $0x70] sm:$0xff] %v2630_v45  ;;  %v1569_v42 = vpop.xlane.xlu0 %1568  ;;  %2649 = vst [vmem:[#allocation8 + $0x8] sm:$0xff] %v2617_v40  ;;  %v2622_v39 = vmul.f32 %v2344_v48, %v1718_v60  ;;  %3526 = vrcp.f32 %v4362_v26  ;;  %v2431_v36 = vrot.slane %v3519_v27, %v4269_v0 }
 0x359   :  { %2648 = vst [vmem:[#allocation8] sm:$0xff] %v2616_v57  ;;  %2651 = vst [vmem:[#allocation8 + $0x18] sm:$0xff] %v2619_v59  ;;  %3528 = vrcp.f32 %v4390_v11 }
 0x35a   :  { %2650 = vst [vmem:[#allocation8 + $0x10] sm:$0xff] %v2618_v12  ;;  %2653 = vst [vmem:[#allocation8 + $0x28] sm:$0xff] %v2621_v20  ;;  %v3521_v19 = vpop.eup %3520 }
 0x35b   :  { %2652 = vst [vmem:[#allocation8 + $0x20] sm:$0xff] %v2620_v9  ;;  %2655 = vst [vmem:[#allocation8 + $0x38] sm:$0xff] %v2623_v8  ;;  %v1605_v14 = vpop.xlane.xlu1 %1604  ;;  %v2506_v38 = vrot.slane %v3521_v19, %v4261_v10 }
 0x35c   :  { %2654 = vst [vmem:[#allocation8 + $0x30] sm:$0xff] %v2622_v39  ;;  %v1599_v44 = vpop.xlane.xlu0 %1598 }
 0x35d   :  { %3530 = vrcp.f32 %v1599_v44 }
 0x35e   :  { %3532 = vrcp.f32 %v4377_v35 }
 0x35f   :  { %v1571_v28 = vpop.xlane.xlu1 %1570  ;;  %3534 = vrcp.f32 %v4394_v63 }
 0x360   :  { %v1573_v13 = vpop.xlane.xlu0 %1572  ;;  %3536 = vrcp.f32 %v1601_v16 }
 0x362   :  { %v3523_v54 = vpop.eup %3522 }
 0x363   :  { %v1609_v56 = vpop.xlane.xlu1 %1608  ;;  %v3525_v3 = vpop.eup %3524  ;;  %v2515_v41 = vrot.slane %v3523_v54, %v4264_v62 }
 0x364   :  { %v1603_v6 = vpop.xlane.xlu0 %1602  ;;  %v2510_v50 = vrot.slane %v3525_v3, %v4269_v0 }
 0x365   :  { %3538 = vrcp.f32 %v1603_v6  ;;  %v3527_v35 = vpop.eup %3526 }
 0x366   :  { %3540 = vrcp.f32 %v1567_v30  ;;  %v3529_v63 = vpop.eup %3528  ;;  %v2427_v24 = vrot.slane %v3527_v35, %v4261_v10  ;;  %v2511_v16 = vsel %vm2245_vm1, %v2510_v50, %v2506_v38 }
 0x367   :  { %v1575_v21 = vpop.xlane.xlu1 %1574  ;;  %3542 = vrcp.f32 %v1569_v42  ;;  %v2436_v7 = vrot.slane %v3529_v63, %v4264_v62  ;;  %v2516_v55 = vsel %vm2252_vm2, %v2515_v41, %v2511_v16 }
 0x368   :  { %v1577_v22 = vpop.xlane.xlu0 %1576  ;;  %3544 = vrcp.f32 %v1605_v14  ;;  %v2432_v57 = vsel %vm2245_vm1, %v2431_v36, %v2427_v24 }
 0x369   :  { %v2437_v30 = vsel %vm2252_vm2, %v2436_v7, %v2432_v57 }
 0x36a   :  { %v3531_v58 = vpop.eup %3530 }
 0x36b   :  { %v1613_v1 = vpop.xlane.xlu1 %1612  ;;  %v3533_v49 = vpop.eup %3532  ;;  %v2525_v17 = vrot.slane %v3531_v58, %v4282_v32 }
 0x36c   :  { %v1607_v53 = vpop.xlane.xlu0 %1606  ;;  %v3535_v43 = vpop.eup %3534  ;;  %v2520_v48 = vrot.slane %v3533_v49, %v4273_v23 }
 0x36d   :  { %3546 = vrcp.f32 %v1607_v53  ;;  %v3537_v61 = vpop.eup %3536  ;;  %v2441_v59 = vrot.slane %v3535_v43, %v4273_v23 }
 0x36e   :  { %3548 = vrcp.f32 %v1571_v28  ;;  %v2521_v62 = vsel %vm2259_vm3, %v2520_v48, %v2516_v55  ;;  %v2530_v8 = vrot.slane %v3537_v61, %v4279_v5 }
 0x36f   :  { %v1579_v26 = vpop.xlane.xlu1 %1578  ;;  %3550 = vrcp.f32 %v1573_v13  ;;  %v2526_v12 = vsel %vm2266_vm4, %v2525_v17, %v2521_v62  ;;  %v2442_v44 = vsel %vm2259_vm3, %v2441_v59, %v2437_v30 }
 0x370   :  { %v1581_v11 = vpop.xlane.xlu0 %1580  ;;  %3552 = vrcp.f32 %v1609_v56  ;;  %v2531_v28 = vsel %vm2273_vm5, %v2530_v8, %v2526_v12 }
 0x371   :  { %3554 = vrcp.f32 %v1575_v21 }
 0x372   :  { %3556 = vrcp.f32 %v1577_v22  ;;  %v3539_v18 = vpop.eup %3538 }
 0x373   :  { %v1617_v29 = vpop.xlane.xlu1 %1616  ;;  %v3541_v10 = vpop.eup %3540  ;;  %v2535_v0 = vrot.slane %v3539_v18, %v4296_v47 }
 0x374   :  { %v1611_v25 = vpop.xlane.xlu0 %1610  ;;  %v3543_v40 = vpop.eup %3542  ;;  %v2446_v42 = vrot.slane %v3541_v10, %v4282_v32 }
 0x375   :  { %3558 = vrcp.f32 %v1611_v25  ;;  %v3545_v60 = vpop.eup %3544  ;;  %v2451_v56 = vrot.slane %v3543_v40, %v4279_v5  ;;  %v2536_v6 = vsel %vm2280_vm6, %v2535_v0, %v2531_v28 }
 0x376   :  { %3560 = vrcp.f32 %v1613_v1  ;;  %v2447_v32 = vsel %vm2266_vm4, %v2446_v42, %v2442_v44  ;;  %v2540_v53 = vrot.slane %v3545_v60, %v4292_v4 }
 0x377   :  { %3562 = vrcp.f32 %v1579_v26  ;;  %v1615_v52 = vpop.xlane.xlu1 %1614  ;;  %v2452_v3 = vsel %vm2273_vm5, %v2451_v56, %v2447_v32 }
 0x378   :  { %3564 = vrcp.f32 %v1615_v52  ;;  %v1585_v45 = vpop.xlane.xlu0 %1584  ;;  %v2541_v5 = vsel %vm2287_vm7, %v2540_v53, %v2536_v6 }
 0x379   :  { %3566 = vrcp.f32 %v1581_v11 }
 0x37a   :  { %3568 = vrcp.f32 %v1617_v29  ;;  %v3547_v9 = vpop.eup %3546 }
 0x37b   :  { %v1619_v20 = vpop.xlane.xlu1 %1618  ;;  %v3549_v23 = vpop.eup %3548  ;;  %v2545_v21 = vrot.slane %v3547_v9, %v4310_v31 }
 0x37c   :  { %3570 = vrcp.f32 %v1619_v20  ;;  %v1583_v39 = vpop.xlane.xlu0 %1582  ;;  %v3551_v14 = vpop.eup %3550  ;;  %v2456_v27 = vrot.slane %v3549_v23, %v4296_v47 }
 0x37d   :  { %3572 = vrcp.f32 %v1583_v39  ;;  %v3553_v13 = vpop.eup %3552  ;;  %v2461_v35 = vrot.slane %v3551_v14, %v4292_v4  ;;  %v2546_v38 = vsel %vm2294_vm8, %v2545_v21, %v2541_v5 }
 0x37e   :  { %3574 = vrcp.f32 %v1585_v45  ;;  %v3555_v1 = vpop.eup %3554  ;;  %v2457_v29 = vsel %vm2280_vm6, %v2456_v27, %v2452_v3  ;;  %v2550_v47 = vrot.slane %v3553_v13, %v4315_v33 }
 0x37f   :  { %v1621_v22 = vpop.xlane.xlu1 %1620  ;;  %v3557_v26 = vpop.eup %3556  ;;  %v2466_v58 = vrot.slane %v3555_v1, %v4310_v31  ;;  %v2462_v4 = vsel %vm2287_vm7, %v2461_v35, %v2457_v29 }
 0x380   :  { %3576 = vrcp.f32 %v1621_v22  ;;  %v1587_v19 = vpop.xlane.xlu0 %1586  ;;  %v2551_v43 = vsel %vm2301_vm9, %v2550_v47, %v2546_v38  ;;  %v2471_v16 = vrot.slane %v3557_v26, %v4315_v33 }
 0x381   :  { %3578 = vrcp.f32 %v1587_v19  ;;  %v2467_v31 = vsel %vm2294_vm8, %v2466_v58, %v2462_v4 }
 0x382   :  { %v3559_v54 = vpop.eup %3558  ;;  %v2472_v33 = vsel %vm2301_vm9, %v2471_v16, %v2467_v31 }
 0x383   :  { %v3561_v11 = vpop.eup %3560  ;;  %v2555_v63 = vrot.slane %v3559_v54, %v4327_v37 }
 0x384   :  { %v3563_v41 = vpop.eup %3562  ;;  %v1589_v50 = vpop.xlane.xlu0 %1588  ;;  %v2560_v18 = vrot.slane %v3561_v11, %v4350_v15 }
 0x385   :  { %v3565_v25 = vpop.eup %3564  ;;  %3580 = vrcp.f32 %v1589_v50  ;;  %v4448_v49 = vpop.f32.mrf.mxu0  ;;  %v2556_v61 = vsel %vm2308_vm10, %v2555_v63, %v2551_v43  ;;  %v2476_v36 = vrot.slane %v3563_v41, %v4327_v37 }
 0x386   :  { %v3567_v24 = vpop.eup %3566  ;;  %v2565_v7 = vrot.slane %v3565_v25, %v4333_v2  ;;  %v3288_v17 = vpop.f32.mrf.mxu1  ;;  %v2561_v57 = vsel %vm2315_vm12, %v2560_v18, %v2556_v61 }
 0x387   :  { %v1898_v55 = vpop.f32.mrf.mxu0  ;;  %v3569_v52 = vpop.eup %3568  ;;  %v2481_v59 = vrot.slane %v3567_v24, %v4350_v15  ;;  %v2477_v20 = vsel %vm2308_vm10, %v2476_v36, %v2472_v33 }
 0x388   :  { %v2003_v10 = vpop.f32.mrf.mxu1  ;;  %v2566_v62 = vsel %vm2322_vm11, %v2565_v7, %v2561_v57  ;;  %v2570_v37 = vrot.slane %v3569_v52, %v4358_v34 }
 0x389   :  { %v3571_v48 = vpop.eup %3570  ;;  %v3247_v45 = vpop.f32.mrf.mxu0  ;;  %v2482_v44 = vsel %vm2315_vm12, %v2481_v59, %v2477_v20 }
 0x38a   :  { %v3573_v40 = vpop.eup %3572  ;;  %v2575_v60 = vrot.slane %v3571_v48, %v4371_v51  ;;  %v3291_v12 = vpop.f32.mrf.mxu1  ;;  %v2571_v15 = vsel %vm2329_vm13, %v2570_v37, %v2566_v62 }
 0x38b   :  { %v1908_v30 = vpop.f32.mrf.mxu0  ;;  %v3575_v0 = vpop.eup %3574  ;;  %v2486_v9 = vrot.slane %v3573_v40, %v4333_v2 }
 0x38c   :  { %v2013_v39 = vpop.f32.mrf.mxu1  ;;  %v2576_v28 = vsel %vm2336_vm14, %v2575_v60, %v2571_v15  ;;  %v2491_v22 = vrot.slane %v3575_v0, %v4358_v34 }
 0x38d   :  { %v3577_v8 = vpop.eup %3576  ;;  %v3250_v42 = vpop.f32.mrf.mxu0  ;;  %v2487_v6 = vsel %vm2322_vm11, %v2486_v9, %v2482_v44 }
 0x38e   :  { %v3579_v23 = vpop.eup %3578  ;;  %v2580_v14 = vrot.slane %v3577_v8, %v4375_v46  ;;  %v3294_v56 = vpop.f32.mrf.mxu1  ;;  %v2492_v35 = vsel %vm2329_vm13, %v2491_v22, %v2487_v6 }
 0x38f   :  { %v1918_v13 = vpop.f32.mrf.mxu0  ;;  %v2496_v21 = vrot.slane %v3579_v23, %v4371_v51 }
 0x390   :  { %v2581_v2 = vsel %vm2343_vm15, %v2580_v14, %v2576_v28  ;;  %v2023_v27 = vpop.f32.mrf.mxu1 }
 0x391   :  { %v2641_v1 = vmul.f32 %v3288_v17, %v2581_v2  ;;  %v2640_v32 = vmul.f32 %v2581_v2, %v2003_v10  ;;  %v2643_v53 = vmul.f32 %v3291_v12, %v2581_v2  ;;  %v2642_v26 = vmul.f32 %v2581_v2, %v2013_v39  ;;  %v3253_v5 = vpop.f32.mrf.mxu0 }
 0x392   :  { %v3581_v19 = vpop.eup %3580  ;;  %v2645_v54 = vmul.f32 %v3294_v56, %v2581_v2  ;;  %v2644_v11 = vmul.f32 %v2581_v2, %v2023_v27  ;;  %v3297_v51 = vpop.f32.mrf.mxu1  ;;  %v2497_v38 = vsel %vm2336_vm14, %v2496_v21, %v2492_v35 }
 0x393   :  { %v2501_v3 = vrot.slane %v3581_v19, %v4375_v46  ;;  %2673 = vst [vmem:[#allocation8 + $0xc8] sm:$0xff] %v2641_v1  ;;  %2672 = vst [vmem:[#allocation8 + $0xc0] sm:$0xff] %v2640_v32  ;;  %v2647_v34 = vmul.f32 %v3297_v51, %v2581_v2  ;;  %v1928_v50 = vpop.f32.mrf.mxu0 }
 0x394   :  { %2675 = vst [vmem:[#allocation8 + $0xd8] sm:$0xff] %v2643_v53  ;;  %2674 = vst [vmem:[#allocation8 + $0xd0] sm:$0xff] %v2642_v26  ;;  %v2033_v41 = vpop.f32.mrf.mxu1 }
 0x395   :  { %2677 = vst [vmem:[#allocation8 + $0xe8] sm:$0xff] %v2645_v54  ;;  %2676 = vst [vmem:[#allocation8 + $0xe0] sm:$0xff] %v2644_v11  ;;  %v2502_v63 = vsel %vm2343_vm15, %v2501_v3, %v2497_v38  ;;  %v2646_v16 = vmul.f32 %v2581_v2, %v2033_v41 }
 0x396   :  { %v2633_v29 = vmul.f32 %v4448_v49, %v2502_v63  ;;  %v2632_v46 = vmul.f32 %v2502_v63, %v1898_v55  ;;  %v2635_v47 = vmul.f32 %v3247_v45, %v2502_v63  ;;  %v2634_v58 = vmul.f32 %v2502_v63, %v1908_v30  ;;  %2679 = vst [vmem:[#allocation8 + $0xf8] sm:$0xff] %v2647_v34 }
 0x397   :  { %v2637_v25 = vmul.f32 %v3250_v42, %v2502_v63  ;;  %v2636_v43 = vmul.f32 %v2502_v63, %v1918_v13  ;;  %v2639_v24 = vmul.f32 %v3253_v5, %v2502_v63  ;;  %v2638_v4 = vmul.f32 %v2502_v63, %v1928_v50  ;;  %2678 = vst [vmem:[#allocation8 + $0xf0] sm:$0xff] %v2646_v16 }
 0x398   :  { %2665 = vst [vmem:[#allocation8 + $0x88] sm:$0xff] %v2633_v29  ;;  %2664 = vst [vmem:[#allocation8 + $0x80] sm:$0xff] %v2632_v46 }
 0x399   :  { %2667 = vst [vmem:[#allocation8 + $0x98] sm:$0xff] %v2635_v47  ;;  %2666 = vst [vmem:[#allocation8 + $0x90] sm:$0xff] %v2634_v58 }
 0x39a   :  { %2669 = vst [vmem:[#allocation8 + $0xa8] sm:$0xff] %v2637_v25  ;;  %2668 = vst [vmem:[#allocation8 + $0xa0] sm:$0xff] %v2636_v43 }
 0x39b   :  { %2671 = vst [vmem:[#allocation8 + $0xb8] sm:$0xff] %v2639_v24  ;;  %2670 = vst [vmem:[#allocation8 + $0xb0] sm:$0xff] %v2638_v4 }
 0x39c   :  { %3593 = shalt.err (!%p3590_p4)
}
 0x39d   :  { %s3633_s29 = smov 128   ;;  %s3634_s30 = smov 8  }
 0x39e   :  { %2691 = dma.vmem_to_hbm [thread:$0]  %s2686_s27, 4096, %s4485_s3, [#allocation4], %s3633_s29, %s3633_s29, %s3634_s30  }
 0x39f   :  { %3606 = dma.done.wait [#allocation4], 4096  }
 0x3a0   :  { %3607 = vsyncadd [#allocation4], 4294963200 }
 0x3a1   :  { %2695 = vsyncpa [#allocation3], 1 }
 0x3a2   :  { %2696 = vsyncpa [#allocation6], 1 }
 0x3a3   :  { %2697 = vsyncpa [#allocation4], 1 }

</bundles_post_ra>
